<compile_context>
chip_gen: v6e
topology: v6e:2x2x1
jax: 0.10.0
libtpu: 0.0.40
codegen_flags: <defaults>
</compile_context>

<pallas_src>
import functools

import jax
import jax.numpy as jnp
from jax import lax
from jax.experimental import pallas as pl
from jax.experimental.pallas import tpu as pltpu


def attention_kernel(x_ref, wqkv_ref, wproj_ref, bproj_ref, o_ref,
                     oheads_ref, *, num_heads):
    """One grid step = one batch row.  Refs:
         x_ref      (1, N, C)  bf16   (cast in wrapper)
         wqkv_ref   (C, 3C)    bf16   (resident; scale folded into Q cols)
         wproj_ref  (C, C)     bf16   (resident)
         bproj_ref  (1, C)     f32    (resident)
         o_ref      (1, N, C)  x.dtype
         oheads_ref (N, C)     bf16   VMEM scratch (per-head outputs)
    """
    H = num_heads
    x = x_ref[0]                                       # (N, C) bf16
    N, C = x.shape
    D = C // H

    # Fused QKV projection: one full-width (N, 3C) MXU matmul, fp32 accum.
    qkv = jnp.dot(x, wqkv_ref[...],
                  preferred_element_type=jnp.float32)  # (N, 3C) f32
    qkv = qkv.astype(jnp.bfloat16)                     # cast once, not per head

    # Static per-head loop (H is small); columns are head-major, d-minor,
    # matching the PyTorch reshape(B, N, 3, H, D).
    for h in range(H):
        qh = qkv[:, h * D:(h + 1) * D]                 # (N, D) bf16 (pre-scaled)
        kh = qkv[:, C + h * D:C + (h + 1) * D]         # (N, D) bf16
        vh = qkv[:, 2 * C + h * D:2 * C + (h + 1) * D]  # (N, D) bf16

        # Scores q @ k^T without materializing k^T: contract D of both.
        s = lax.dot_general(qh, kh,
                            dimension_numbers=(((1,), (1,)), ((), ())),
                            preferred_element_type=jnp.float32)  # (N, N) f32

        # Softmax in fp32; normalize AFTER attn @ v (N*D work, not N*N).
        m = jnp.max(s, axis=-1, keepdims=True)
        p = jnp.exp(s - m)
        l = jnp.sum(p, axis=-1, keepdims=True)

        oh = jnp.dot(p.astype(jnp.bfloat16), vh,
                     preferred_element_type=jnp.float32)          # (N, D) f32
        oh = oh * pl.reciprocal(l, approx=True)                   # EUP slot

        oheads_ref[:, h * D:(h + 1) * D] = oh.astype(jnp.bfloat16)

    # Single output projection at full contraction depth K=C, then bias.
    out = jnp.dot(oheads_ref[...], wproj_ref[...],
                  preferred_element_type=jnp.float32)             # (N, C) f32
    o_ref[0] = (out + bproj_ref[...]).astype(o_ref.dtype)


def attention_forward(x, w_qkv, w_proj, b_proj, *, num_heads):
    """x: (B, N, C); w_qkv: (C, 3C) [in,out]; w_proj: (C, C) [in,out];
    b_proj: (1, C).  Returns (B, N, C) in x.dtype."""
    B, N, C = x.shape
    H = num_heads
    D = C // H
    scale = D ** (-0.5)

    # Offline weight prep (amortized / load-time):
    #  - fold the softmax scale into the Q columns (exact: qkv_bias=False),
    #  - cast weights to bf16, keep bias fp32,
    #  - cast activations to bf16 once (halves x DMA bytes).
    wqkv_b = (w_qkv.at[:, :C].multiply(scale)).astype(jnp.bfloat16)   # (C, 3C)
    wproj_b = w_proj.astype(jnp.bfloat16)                             # (C, C)
    b_proj_f = b_proj.astype(jnp.float32)                             # (1, C)
    x_b = x.astype(jnp.bfloat16)

    # Rough VMEM budget (blocks are double-buffered by the pipeline) so we can
    # raise the scoped limit explicitly (v5e default 16 MiB) while staying
    # comfortably inside v7x's 64 MiB physical VMEM.
    out_itemsize = jnp.dtype(x.dtype).itemsize
    est = (2 * N * C * 2                      # x blocks (bf16)
           + 2 * N * C * out_itemsize         # out blocks
           + 2 * (3 * C * C + C * C) * 2      # resident weights (2 bufs)
           + 2 * 2 * C * 4                    # bias
           + N * C * 2                        # heads-out scratch
           + N * 3 * C * (4 + 2)              # qkv live values (f32 + bf16)
           + 2 * N * N * 4                    # per-head scores / probs
           + (1 << 20))                       # headroom
    vmem_limit = int(min(max(2 * est, 16 << 20), 48 << 20))

    kernel = functools.partial(attention_kernel, num_heads=H)

    return pl.pallas_call(
        kernel,
        out_shape=jax.ShapeDtypeStruct((B, N, C), x.dtype),
        grid=(B,),
        in_specs=[
            pl.BlockSpec((1, N, C), lambda b: (b, 0, 0)),   # x: one batch row
            pl.BlockSpec((C, 3 * C), lambda b: (0, 0)),     # Wqkv (resident)
            pl.BlockSpec((C, C), lambda b: (0, 0)),         # Wproj (resident)
            pl.BlockSpec((1, C), lambda b: (0, 0)),         # bias  (resident)
        ],
        out_specs=pl.BlockSpec((1, N, C), lambda b: (b, 0, 0)),
        scratch_shapes=[pltpu.VMEM((N, C), jnp.bfloat16)],  # per-head outputs
        compiler_params=pltpu.CompilerParams(
            dimension_semantics=("parallel",),
            vmem_limit_bytes=vmem_limit),
    )(x_b, wqkv_b, wproj_b, b_proj_f)


def attention_reference(x, w_qkv, w_proj, b_proj, *, num_heads):
    """Pure-JAX fp32 reference mirroring the PyTorch forward."""
    B, N, C = x.shape
    D = C // num_heads
    scale = D ** (-0.5)
    qkv = jnp.einsum("bnc,cd->bnd", x, w_qkv).reshape(B, N, 3, num_heads, D)
    qkv = jnp.transpose(qkv, (2, 0, 3, 1, 4))                 # (3, B, H, N, D)
    q, k, v = qkv[0], qkv[1], qkv[2]
    attn = jnp.einsum("bhnd,bhmd->bhnm", q, k) * scale
    attn = jax.nn.softmax(attn, axis=-1)
    out = jnp.einsum("bhnm,bhmd->bhnd", attn, v)
    out = jnp.transpose(out, (0, 2, 1, 3)).reshape(B, N, C)
    return jnp.einsum("bnc,cd->bnd", out, w_proj) + b_proj


if __name__ == "__main__":
    B, N, C = 2, 16, 128
    num_heads = 8

    key = jax.random.PRNGKey(0)
    kx, kw1, kw2, kb = jax.random.split(key, 4)

    x = jax.random.normal(kx, (B, N, C), dtype=jnp.float32)
    # Linear weights stored as [in, out]; bias as (1, C).
    w_qkv = jax.random.normal(kw1, (C, 3 * C), dtype=jnp.float32) * (C ** -0.5)
    w_proj = jax.random.normal(kw2, (C, C), dtype=jnp.float32) * (C ** -0.5)
    b_proj = jax.random.normal(kb, (1, C), dtype=jnp.float32) * 0.02

    out = attention_forward(x, w_qkv, w_proj, b_proj, num_heads=num_heads)
    out = jax.block_until_ready(out)

    ref = attention_reference(x, w_qkv, w_proj, b_proj, num_heads=num_heads)
    assert out.shape == (B, N, C)
    # bf16 MXU operands + approx reciprocal vs fp32 reference -> relaxed tol.
    max_err = jnp.max(jnp.abs(out - ref))
    assert jnp.allclose(out, ref, atol=5e-2, rtol=5e-2), \
        f"mismatch, max|err|={max_err}"

    print("KERNEL_OK")
</pallas_src>

<mosaic_0001>
module attributes {stable_mosaic.version = 11 : i64} {
  func.func @attention_kernel(%arg0: i32, %arg1: memref<1x16x128xbf16, #tpu.memory_space<vmem>>, %arg2: memref<128x384xbf16, #tpu.memory_space<vmem>>, %arg3: memref<128x128xbf16, #tpu.memory_space<vmem>>, %arg4: memref<1x128xf32, #tpu.memory_space<vmem>>, %arg5: memref<1x16x128xf32, #tpu.memory_space<vmem>>, %arg6: memref<16x128xbf16, #tpu.memory_space<vmem>>) attributes {dimension_semantics = [#tpu.dimension_semantics<parallel>], iteration_bounds = array<i64: 2>, scalar_prefetch = 0 : i64, scratch_operands = 1 : i64, tpu.core_type = #tpu.core_type<tc>, window_params = [{transform_indices = @transform_0, window_bounds = array<i64: 1, 16, 128>}, {pipeline_mode = #tpu.pipeline_mode<synchronous>, transform_indices = @transform_1, window_bounds = array<i64: 128, 384>}, {pipeline_mode = #tpu.pipeline_mode<synchronous>, transform_indices = @transform_2, window_bounds = array<i64: 128, 128>}, {pipeline_mode = #tpu.pipeline_mode<synchronous>, transform_indices = @transform_3, window_bounds = array<i64: 1, 128>}, {transform_indices = @transform_4, window_bounds = array<i64: 1, 16, 128>}]} {
    %c0 = arith.constant 0 : index
    %c0_0 = arith.constant 0 : index
    %c0_1 = arith.constant 0 : index
    %0 = vector.load %arg1[%c0, %c0_0, %c0_1] : memref<1x16x128xbf16, #tpu.memory_space<vmem>>, vector<1x16x128xbf16>
    %1 = vector.shape_cast %0 : vector<1x16x128xbf16> to vector<16x128xbf16>
    %c0_2 = arith.constant 0 : index
    %c0_3 = arith.constant 0 : index
    %2 = vector.load %arg2[%c0_2, %c0_3] : memref<128x384xbf16, #tpu.memory_space<vmem>>, vector<128x384xbf16>
    %cst = arith.constant dense<0.000000e+00> : vector<16x384xf32>
    %3 = tpu.matmul %1, %2, %cst {dimension_numbers = #tpu.dot_dimension_numbers<[1], [0], [0], [1], [0, 0, 1, 1], [], []>} : vector<16x128xbf16>, vector<128x384xbf16>, vector<16x384xf32> -> vector<16x384xf32>
    %4 = arith.truncf %3 : vector<16x384xf32> to vector<16x384xbf16>
    %5 = vector.extract_strided_slice %4 {offsets = [0, 0], sizes = [16, 16], strides = [1, 1]} : vector<16x384xbf16> to vector<16x16xbf16>
    %6 = vector.extract_strided_slice %4 {offsets = [0, 128], sizes = [16, 16], strides = [1, 1]} : vector<16x384xbf16> to vector<16x16xbf16>
    %7 = vector.extract_strided_slice %4 {offsets = [0, 256], sizes = [16, 16], strides = [1, 1]} : vector<16x384xbf16> to vector<16x16xbf16>
    %cst_4 = arith.constant dense<0.000000e+00> : vector<16x16xf32>
    %8 = tpu.matmul %5, %6, %cst_4 {dimension_numbers = #tpu.dot_dimension_numbers<[1], [1], [0], [0], [0, 0, 1, 0], [], []>} : vector<16x16xbf16>, vector<16x16xbf16>, vector<16x16xf32> -> vector<16x16xf32>
    %cst_5 = arith.constant dense<0xFF800000> : vector<16xf32>
    %9 = vector.multi_reduction <maximumf>, %8, %cst_5 [1] : vector<16x16xf32> to vector<16xf32>
    %10 = vector.shape_cast %9 : vector<16xf32> to vector<16x1xf32>
    %11 = vector.broadcast %10 : vector<16x1xf32> to vector<16x16xf32>
    %12 = arith.subf %8, %11 : vector<16x16xf32>
    %13 = math.exp %12 : vector<16x16xf32>
    %cst_6 = arith.constant dense<0.000000e+00> : vector<16xf32>
    %14 = vector.multi_reduction <add>, %13, %cst_6 [1] : vector<16x16xf32> to vector<16xf32>
    %15 = vector.shape_cast %14 : vector<16xf32> to vector<16x1xf32>
    %16 = arith.truncf %13 : vector<16x16xf32> to vector<16x16xbf16>
    %cst_7 = arith.constant dense<0.000000e+00> : vector<16x16xf32>
    %17 = tpu.matmul %16, %7, %cst_7 {dimension_numbers = #tpu.dot_dimension_numbers<[1], [0], [0], [1], [0, 0, 1, 1], [], []>} : vector<16x16xbf16>, vector<16x16xbf16>, vector<16x16xf32> -> vector<16x16xf32>
    %18 = tpu.reciprocal %15 {approx = true} : vector<16x1xf32> -> vector<16x1xf32>
    %19 = vector.broadcast %18 : vector<16x1xf32> to vector<16x16xf32>
    %20 = arith.mulf %17, %19 : vector<16x16xf32>
    %21 = arith.truncf %20 : vector<16x16xf32> to vector<16x16xbf16>
    %c0_8 = arith.constant 0 : index
    %c0_9 = arith.constant 0 : index
    %22 = vector.load %arg6[%c0_8, %c0_9] : memref<16x128xbf16, #tpu.memory_space<vmem>>, vector<16x16xbf16>
    tpu.vector_store %arg6[%c0_8, %c0_9], %21 {strides = array<i32>} : memref<16x128xbf16, #tpu.memory_space<vmem>>, vector<16x16xbf16>,
    %23 = vector.extract_strided_slice %4 {offsets = [0, 16], sizes = [16, 16], strides = [1, 1]} : vector<16x384xbf16> to vector<16x16xbf16>
    %24 = vector.extract_strided_slice %4 {offsets = [0, 144], sizes = [16, 16], strides = [1, 1]} : vector<16x384xbf16> to vector<16x16xbf16>
    %25 = vector.extract_strided_slice %4 {offsets = [0, 272], sizes = [16, 16], strides = [1, 1]} : vector<16x384xbf16> to vector<16x16xbf16>
    %cst_10 = arith.constant dense<0.000000e+00> : vector<16x16xf32>
    %26 = tpu.matmul %23, %24, %cst_10 {dimension_numbers = #tpu.dot_dimension_numbers<[1], [1], [0], [0], [0, 0, 1, 0], [], []>} : vector<16x16xbf16>, vector<16x16xbf16>, vector<16x16xf32> -> vector<16x16xf32>
    %cst_11 = arith.constant dense<0xFF800000> : vector<16xf32>
    %27 = vector.multi_reduction <maximumf>, %26, %cst_11 [1] : vector<16x16xf32> to vector<16xf32>
    %28 = vector.shape_cast %27 : vector<16xf32> to vector<16x1xf32>
    %29 = vector.broadcast %28 : vector<16x1xf32> to vector<16x16xf32>
    %30 = arith.subf %26, %29 : vector<16x16xf32>
    %31 = math.exp %30 : vector<16x16xf32>
    %cst_12 = arith.constant dense<0.000000e+00> : vector<16xf32>
    %32 = vector.multi_reduction <add>, %31, %cst_12 [1] : vector<16x16xf32> to vector<16xf32>
    %33 = vector.shape_cast %32 : vector<16xf32> to vector<16x1xf32>
    %34 = arith.truncf %31 : vector<16x16xf32> to vector<16x16xbf16>
    %cst_13 = arith.constant dense<0.000000e+00> : vector<16x16xf32>
    %35 = tpu.matmul %34, %25, %cst_13 {dimension_numbers = #tpu.dot_dimension_numbers<[1], [0], [0], [1], [0, 0, 1, 1], [], []>} : vector<16x16xbf16>, vector<16x16xbf16>, vector<16x16xf32> -> vector<16x16xf32>
    %36 = tpu.reciprocal %33 {approx = true} : vector<16x1xf32> -> vector<16x1xf32>
    %37 = vector.broadcast %36 : vector<16x1xf32> to vector<16x16xf32>
    %38 = arith.mulf %35, %37 : vector<16x16xf32>
    %39 = arith.truncf %38 : vector<16x16xf32> to vector<16x16xbf16>
    %c0_14 = arith.constant 0 : index
    %c16 = arith.constant 16 : index
    %40 = vector.load %arg6[%c0_14, %c16] : memref<16x128xbf16, #tpu.memory_space<vmem>>, vector<16x16xbf16>
    tpu.vector_store %arg6[%c0_14, %c16], %39 {strides = array<i32>} : memref<16x128xbf16, #tpu.memory_space<vmem>>, vector<16x16xbf16>,
    %41 = vector.extract_strided_slice %4 {offsets = [0, 32], sizes = [16, 16], strides = [1, 1]} : vector<16x384xbf16> to vector<16x16xbf16>
    %42 = vector.extract_strided_slice %4 {offsets = [0, 160], sizes = [16, 16], strides = [1, 1]} : vector<16x384xbf16> to vector<16x16xbf16>
    %43 = vector.extract_strided_slice %4 {offsets = [0, 288], sizes = [16, 16], strides = [1, 1]} : vector<16x384xbf16> to vector<16x16xbf16>
    %cst_15 = arith.constant dense<0.000000e+00> : vector<16x16xf32>
    %44 = tpu.matmul %41, %42, %cst_15 {dimension_numbers = #tpu.dot_dimension_numbers<[1], [1], [0], [0], [0, 0, 1, 0], [], []>} : vector<16x16xbf16>, vector<16x16xbf16>, vector<16x16xf32> -> vector<16x16xf32>
    %cst_16 = arith.constant dense<0xFF800000> : vector<16xf32>
    %45 = vector.multi_reduction <maximumf>, %44, %cst_16 [1] : vector<16x16xf32> to vector<16xf32>
    %46 = vector.shape_cast %45 : vector<16xf32> to vector<16x1xf32>
    %47 = vector.broadcast %46 : vector<16x1xf32> to vector<16x16xf32>
    %48 = arith.subf %44, %47 : vector<16x16xf32>
    %49 = math.exp %48 : vector<16x16xf32>
    %cst_17 = arith.constant dense<0.000000e+00> : vector<16xf32>
    %50 = vector.multi_reduction <add>, %49, %cst_17 [1] : vector<16x16xf32> to vector<16xf32>
    %51 = vector.shape_cast %50 : vector<16xf32> to vector<16x1xf32>
    %52 = arith.truncf %49 : vector<16x16xf32> to vector<16x16xbf16>
    %cst_18 = arith.constant dense<0.000000e+00> : vector<16x16xf32>
    %53 = tpu.matmul %52, %43, %cst_18 {dimension_numbers = #tpu.dot_dimension_numbers<[1], [0], [0], [1], [0, 0, 1, 1], [], []>} : vector<16x16xbf16>, vector<16x16xbf16>, vector<16x16xf32> -> vector<16x16xf32>
    %54 = tpu.reciprocal %51 {approx = true} : vector<16x1xf32> -> vector<16x1xf32>
    %55 = vector.broadcast %54 : vector<16x1xf32> to vector<16x16xf32>
    %56 = arith.mulf %53, %55 : vector<16x16xf32>
    %57 = arith.truncf %56 : vector<16x16xf32> to vector<16x16xbf16>
    %c0_19 = arith.constant 0 : index
    %c32 = arith.constant 32 : index
    %58 = vector.load %arg6[%c0_19, %c32] : memref<16x128xbf16, #tpu.memory_space<vmem>>, vector<16x16xbf16>
    tpu.vector_store %arg6[%c0_19, %c32], %57 {strides = array<i32>} : memref<16x128xbf16, #tpu.memory_space<vmem>>, vector<16x16xbf16>,
    %59 = vector.extract_strided_slice %4 {offsets = [0, 48], sizes = [16, 16], strides = [1, 1]} : vector<16x384xbf16> to vector<16x16xbf16>
    %60 = vector.extract_strided_slice %4 {offsets = [0, 176], sizes = [16, 16], strides = [1, 1]} : vector<16x384xbf16> to vector<16x16xbf16>
    %61 = vector.extract_strided_slice %4 {offsets = [0, 304], sizes = [16, 16], strides = [1, 1]} : vector<16x384xbf16> to vector<16x16xbf16>
    %cst_20 = arith.constant dense<0.000000e+00> : vector<16x16xf32>
    %62 = tpu.matmul %59, %60, %cst_20 {dimension_numbers = #tpu.dot_dimension_numbers<[1], [1], [0], [0], [0, 0, 1, 0], [], []>} : vector<16x16xbf16>, vector<16x16xbf16>, vector<16x16xf32> -> vector<16x16xf32>
    %cst_21 = arith.constant dense<0xFF800000> : vector<16xf32>
    %63 = vector.multi_reduction <maximumf>, %62, %cst_21 [1] : vector<16x16xf32> to vector<16xf32>
    %64 = vector.shape_cast %63 : vector<16xf32> to vector<16x1xf32>
    %65 = vector.broadcast %64 : vector<16x1xf32> to vector<16x16xf32>
    %66 = arith.subf %62, %65 : vector<16x16xf32>
    %67 = math.exp %66 : vector<16x16xf32>
    %cst_22 = arith.constant dense<0.000000e+00> : vector<16xf32>
    %68 = vector.multi_reduction <add>, %67, %cst_22 [1] : vector<16x16xf32> to vector<16xf32>
    %69 = vector.shape_cast %68 : vector<16xf32> to vector<16x1xf32>
    %70 = arith.truncf %67 : vector<16x16xf32> to vector<16x16xbf16>
    %cst_23 = arith.constant dense<0.000000e+00> : vector<16x16xf32>
    %71 = tpu.matmul %70, %61, %cst_23 {dimension_numbers = #tpu.dot_dimension_numbers<[1], [0], [0], [1], [0, 0, 1, 1], [], []>} : vector<16x16xbf16>, vector<16x16xbf16>, vector<16x16xf32> -> vector<16x16xf32>
    %72 = tpu.reciprocal %69 {approx = true} : vector<16x1xf32> -> vector<16x1xf32>
    %73 = vector.broadcast %72 : vector<16x1xf32> to vector<16x16xf32>
    %74 = arith.mulf %71, %73 : vector<16x16xf32>
    %75 = arith.truncf %74 : vector<16x16xf32> to vector<16x16xbf16>
    %c0_24 = arith.constant 0 : index
    %c48 = arith.constant 48 : index
    %76 = vector.load %arg6[%c0_24, %c48] : memref<16x128xbf16, #tpu.memory_space<vmem>>, vector<16x16xbf16>
    tpu.vector_store %arg6[%c0_24, %c48], %75 {strides = array<i32>} : memref<16x128xbf16, #tpu.memory_space<vmem>>, vector<16x16xbf16>,
    %77 = vector.extract_strided_slice %4 {offsets = [0, 64], sizes = [16, 16], strides = [1, 1]} : vector<16x384xbf16> to vector<16x16xbf16>
    %78 = vector.extract_strided_slice %4 {offsets = [0, 192], sizes = [16, 16], strides = [1, 1]} : vector<16x384xbf16> to vector<16x16xbf16>
    %79 = vector.extract_strided_slice %4 {offsets = [0, 320], sizes = [16, 16], strides = [1, 1]} : vector<16x384xbf16> to vector<16x16xbf16>
    %cst_25 = arith.constant dense<0.000000e+00> : vector<16x16xf32>
    %80 = tpu.matmul %77, %78, %cst_25 {dimension_numbers = #tpu.dot_dimension_numbers<[1], [1], [0], [0], [0, 0, 1, 0], [], []>} : vector<16x16xbf16>, vector<16x16xbf16>, vector<16x16xf32> -> vector<16x16xf32>
    %cst_26 = arith.constant dense<0xFF800000> : vector<16xf32>
    %81 = vector.multi_reduction <maximumf>, %80, %cst_26 [1] : vector<16x16xf32> to vector<16xf32>
    %82 = vector.shape_cast %81 : vector<16xf32> to vector<16x1xf32>
    %83 = vector.broadcast %82 : vector<16x1xf32> to vector<16x16xf32>
    %84 = arith.subf %80, %83 : vector<16x16xf32>
    %85 = math.exp %84 : vector<16x16xf32>
    %cst_27 = arith.constant dense<0.000000e+00> : vector<16xf32>
    %86 = vector.multi_reduction <add>, %85, %cst_27 [1] : vector<16x16xf32> to vector<16xf32>
    %87 = vector.shape_cast %86 : vector<16xf32> to vector<16x1xf32>
    %88 = arith.truncf %85 : vector<16x16xf32> to vector<16x16xbf16>
    %cst_28 = arith.constant dense<0.000000e+00> : vector<16x16xf32>
    %89 = tpu.matmul %88, %79, %cst_28 {dimension_numbers = #tpu.dot_dimension_numbers<[1], [0], [0], [1], [0, 0, 1, 1], [], []>} : vector<16x16xbf16>, vector<16x16xbf16>, vector<16x16xf32> -> vector<16x16xf32>
    %90 = tpu.reciprocal %87 {approx = true} : vector<16x1xf32> -> vector<16x1xf32>
    %91 = vector.broadcast %90 : vector<16x1xf32> to vector<16x16xf32>
    %92 = arith.mulf %89, %91 : vector<16x16xf32>
    %93 = arith.truncf %92 : vector<16x16xf32> to vector<16x16xbf16>
    %c0_29 = arith.constant 0 : index
    %c64 = arith.constant 64 : index
    %94 = vector.load %arg6[%c0_29, %c64] : memref<16x128xbf16, #tpu.memory_space<vmem>>, vector<16x16xbf16>
    tpu.vector_store %arg6[%c0_29, %c64], %93 {strides = array<i32>} : memref<16x128xbf16, #tpu.memory_space<vmem>>, vector<16x16xbf16>,
    %95 = vector.extract_strided_slice %4 {offsets = [0, 80], sizes = [16, 16], strides = [1, 1]} : vector<16x384xbf16> to vector<16x16xbf16>
    %96 = vector.extract_strided_slice %4 {offsets = [0, 208], sizes = [16, 16], strides = [1, 1]} : vector<16x384xbf16> to vector<16x16xbf16>
    %97 = vector.extract_strided_slice %4 {offsets = [0, 336], sizes = [16, 16], strides = [1, 1]} : vector<16x384xbf16> to vector<16x16xbf16>
    %cst_30 = arith.constant dense<0.000000e+00> : vector<16x16xf32>
    %98 = tpu.matmul %95, %96, %cst_30 {dimension_numbers = #tpu.dot_dimension_numbers<[1], [1], [0], [0], [0, 0, 1, 0], [], []>} : vector<16x16xbf16>, vector<16x16xbf16>, vector<16x16xf32> -> vector<16x16xf32>
    %cst_31 = arith.constant dense<0xFF800000> : vector<16xf32>
    %99 = vector.multi_reduction <maximumf>, %98, %cst_31 [1] : vector<16x16xf32> to vector<16xf32>
    %100 = vector.shape_cast %99 : vector<16xf32> to vector<16x1xf32>
    %101 = vector.broadcast %100 : vector<16x1xf32> to vector<16x16xf32>
    %102 = arith.subf %98, %101 : vector<16x16xf32>
    %103 = math.exp %102 : vector<16x16xf32>
    %cst_32 = arith.constant dense<0.000000e+00> : vector<16xf32>
    %104 = vector.multi_reduction <add>, %103, %cst_32 [1] : vector<16x16xf32> to vector<16xf32>
    %105 = vector.shape_cast %104 : vector<16xf32> to vector<16x1xf32>
    %106 = arith.truncf %103 : vector<16x16xf32> to vector<16x16xbf16>
    %cst_33 = arith.constant dense<0.000000e+00> : vector<16x16xf32>
    %107 = tpu.matmul %106, %97, %cst_33 {dimension_numbers = #tpu.dot_dimension_numbers<[1], [0], [0], [1], [0, 0, 1, 1], [], []>} : vector<16x16xbf16>, vector<16x16xbf16>, vector<16x16xf32> -> vector<16x16xf32>
    %108 = tpu.reciprocal %105 {approx = true} : vector<16x1xf32> -> vector<16x1xf32>
    %109 = vector.broadcast %108 : vector<16x1xf32> to vector<16x16xf32>
    %110 = arith.mulf %107, %109 : vector<16x16xf32>
    %111 = arith.truncf %110 : vector<16x16xf32> to vector<16x16xbf16>
    %c0_34 = arith.constant 0 : index
    %c80 = arith.constant 80 : index
    %112 = vector.load %arg6[%c0_34, %c80] : memref<16x128xbf16, #tpu.memory_space<vmem>>, vector<16x16xbf16>
    tpu.vector_store %arg6[%c0_34, %c80], %111 {strides = array<i32>} : memref<16x128xbf16, #tpu.memory_space<vmem>>, vector<16x16xbf16>,
    %113 = vector.extract_strided_slice %4 {offsets = [0, 96], sizes = [16, 16], strides = [1, 1]} : vector<16x384xbf16> to vector<16x16xbf16>
    %114 = vector.extract_strided_slice %4 {offsets = [0, 224], sizes = [16, 16], strides = [1, 1]} : vector<16x384xbf16> to vector<16x16xbf16>
    %115 = vector.extract_strided_slice %4 {offsets = [0, 352], sizes = [16, 16], strides = [1, 1]} : vector<16x384xbf16> to vector<16x16xbf16>
    %cst_35 = arith.constant dense<0.000000e+00> : vector<16x16xf32>
    %116 = tpu.matmul %113, %114, %cst_35 {dimension_numbers = #tpu.dot_dimension_numbers<[1], [1], [0], [0], [0, 0, 1, 0], [], []>} : vector<16x16xbf16>, vector<16x16xbf16>, vector<16x16xf32> -> vector<16x16xf32>
    %cst_36 = arith.constant dense<0xFF800000> : vector<16xf32>
    %117 = vector.multi_reduction <maximumf>, %116, %cst_36 [1] : vector<16x16xf32> to vector<16xf32>
    %118 = vector.shape_cast %117 : vector<16xf32> to vector<16x1xf32>
    %119 = vector.broadcast %118 : vector<16x1xf32> to vector<16x16xf32>
    %120 = arith.subf %116, %119 : vector<16x16xf32>
    %121 = math.exp %120 : vector<16x16xf32>
    %cst_37 = arith.constant dense<0.000000e+00> : vector<16xf32>
    %122 = vector.multi_reduction <add>, %121, %cst_37 [1] : vector<16x16xf32> to vector<16xf32>
    %123 = vector.shape_cast %122 : vector<16xf32> to vector<16x1xf32>
    %124 = arith.truncf %121 : vector<16x16xf32> to vector<16x16xbf16>
    %cst_38 = arith.constant dense<0.000000e+00> : vector<16x16xf32>
    %125 = tpu.matmul %124, %115, %cst_38 {dimension_numbers = #tpu.dot_dimension_numbers<[1], [0], [0], [1], [0, 0, 1, 1], [], []>} : vector<16x16xbf16>, vector<16x16xbf16>, vector<16x16xf32> -> vector<16x16xf32>
    %126 = tpu.reciprocal %123 {approx = true} : vector<16x1xf32> -> vector<16x1xf32>
    %127 = vector.broadcast %126 : vector<16x1xf32> to vector<16x16xf32>
    %128 = arith.mulf %125, %127 : vector<16x16xf32>
    %129 = arith.truncf %128 : vector<16x16xf32> to vector<16x16xbf16>
    %c0_39 = arith.constant 0 : index
    %c96 = arith.constant 96 : index
    %130 = vector.load %arg6[%c0_39, %c96] : memref<16x128xbf16, #tpu.memory_space<vmem>>, vector<16x16xbf16>
    tpu.vector_store %arg6[%c0_39, %c96], %129 {strides = array<i32>} : memref<16x128xbf16, #tpu.memory_space<vmem>>, vector<16x16xbf16>,
    %131 = vector.extract_strided_slice %4 {offsets = [0, 112], sizes = [16, 16], strides = [1, 1]} : vector<16x384xbf16> to vector<16x16xbf16>
    %132 = vector.extract_strided_slice %4 {offsets = [0, 240], sizes = [16, 16], strides = [1, 1]} : vector<16x384xbf16> to vector<16x16xbf16>
    %133 = vector.extract_strided_slice %4 {offsets = [0, 368], sizes = [16, 16], strides = [1, 1]} : vector<16x384xbf16> to vector<16x16xbf16>
    %cst_40 = arith.constant dense<0.000000e+00> : vector<16x16xf32>
    %134 = tpu.matmul %131, %132, %cst_40 {dimension_numbers = #tpu.dot_dimension_numbers<[1], [1], [0], [0], [0, 0, 1, 0], [], []>} : vector<16x16xbf16>, vector<16x16xbf16>, vector<16x16xf32> -> vector<16x16xf32>
    %cst_41 = arith.constant dense<0xFF800000> : vector<16xf32>
    %135 = vector.multi_reduction <maximumf>, %134, %cst_41 [1] : vector<16x16xf32> to vector<16xf32>
    %136 = vector.shape_cast %135 : vector<16xf32> to vector<16x1xf32>
    %137 = vector.broadcast %136 : vector<16x1xf32> to vector<16x16xf32>
    %138 = arith.subf %134, %137 : vector<16x16xf32>
    %139 = math.exp %138 : vector<16x16xf32>
    %cst_42 = arith.constant dense<0.000000e+00> : vector<16xf32>
    %140 = vector.multi_reduction <add>, %139, %cst_42 [1] : vector<16x16xf32> to vector<16xf32>
    %141 = vector.shape_cast %140 : vector<16xf32> to vector<16x1xf32>
    %142 = arith.truncf %139 : vector<16x16xf32> to vector<16x16xbf16>
    %cst_43 = arith.constant dense<0.000000e+00> : vector<16x16xf32>
    %143 = tpu.matmul %142, %133, %cst_43 {dimension_numbers = #tpu.dot_dimension_numbers<[1], [0], [0], [1], [0, 0, 1, 1], [], []>} : vector<16x16xbf16>, vector<16x16xbf16>, vector<16x16xf32> -> vector<16x16xf32>
    %144 = tpu.reciprocal %141 {approx = true} : vector<16x1xf32> -> vector<16x1xf32>
    %145 = vector.broadcast %144 : vector<16x1xf32> to vector<16x16xf32>
    %146 = arith.mulf %143, %145 : vector<16x16xf32>
    %147 = arith.truncf %146 : vector<16x16xf32> to vector<16x16xbf16>
    %c0_44 = arith.constant 0 : index
    %c112 = arith.constant 112 : index
    %148 = vector.load %arg6[%c0_44, %c112] : memref<16x128xbf16, #tpu.memory_space<vmem>>, vector<16x16xbf16>
    tpu.vector_store %arg6[%c0_44, %c112], %147 {strides = array<i32>} : memref<16x128xbf16, #tpu.memory_space<vmem>>, vector<16x16xbf16>,
    %c0_45 = arith.constant 0 : index
    %c0_46 = arith.constant 0 : index
    %149 = vector.load %arg6[%c0_45, %c0_46] : memref<16x128xbf16, #tpu.memory_space<vmem>>, vector<16x128xbf16>
    %c0_47 = arith.constant 0 : index
    %c0_48 = arith.constant 0 : index
    %150 = vector.load %arg3[%c0_47, %c0_48] : memref<128x128xbf16, #tpu.memory_space<vmem>>, vector<128x128xbf16>
    %cst_49 = arith.constant dense<0.000000e+00> : vector<16x128xf32>
    %151 = tpu.matmul %149, %150, %cst_49 {dimension_numbers = #tpu.dot_dimension_numbers<[1], [0], [0], [1], [0, 0, 1, 1], [], []>} : vector<16x128xbf16>, vector<128x128xbf16>, vector<16x128xf32> -> vector<16x128xf32>
    %c0_50 = arith.constant 0 : index
    %c0_51 = arith.constant 0 : index
    %152 = vector.load %arg4[%c0_50, %c0_51] : memref<1x128xf32, #tpu.memory_space<vmem>>, vector<1x128xf32>
    %153 = vector.broadcast %152 : vector<1x128xf32> to vector<16x128xf32>
    %154 = arith.addf %151, %153 : vector<16x128xf32>
    %c0_52 = arith.constant 0 : index
    %c0_53 = arith.constant 0 : index
    %c0_54 = arith.constant 0 : index
    %155 = vector.load %arg5[%c0_52, %c0_53, %c0_54] : memref<1x16x128xf32, #tpu.memory_space<vmem>>, vector<1x16x128xf32>
    %156 = vector.shape_cast %155 : vector<1x16x128xf32> to vector<16x128xf32>
    %157 = vector.shape_cast %154 : vector<16x128xf32> to vector<1x16x128xf32>
    tpu.vector_store %arg5[%c0_52, %c0_53, %c0_54], %157 {strides = array<i32>} : memref<1x16x128xf32, #tpu.memory_space<vmem>>, vector<1x16x128xf32>,
    return
  }
  func.func @transform_0(%arg0: i32) -> (i32, i32, i32) {
    %c0_i32 = arith.constant 0 : i32
    %c0_i32_0 = arith.constant 0 : i32
    %c0_i32_1 = arith.constant 0 : i32
    return %arg0, %c0_i32, %c0_i32_0 : i32, i32, i32
  }
  func.func @transform_1(%arg0: i32) -> (i32, i32) {
    %c0_i32 = arith.constant 0 : i32
    %c0_i32_0 = arith.constant 0 : i32
    %c0_i32_1 = arith.constant 0 : i32
    return %c0_i32, %c0_i32_0 : i32, i32
  }
  func.func @transform_2(%arg0: i32) -> (i32, i32) {
    %c0_i32 = arith.constant 0 : i32
    %c0_i32_0 = arith.constant 0 : i32
    %c0_i32_1 = arith.constant 0 : i32
    return %c0_i32, %c0_i32_0 : i32, i32
  }
  func.func @transform_3(%arg0: i32) -> (i32, i32) {
    %c0_i32 = arith.constant 0 : i32
    %c0_i32_0 = arith.constant 0 : i32
    %c0_i32_1 = arith.constant 0 : i32
    return %c0_i32, %c0_i32_0 : i32, i32
  }
  func.func @transform_4(%arg0: i32) -> (i32, i32, i32) {
    %c0_i32 = arith.constant 0 : i32
    %c0_i32_0 = arith.constant 0 : i32
    %c0_i32_1 = arith.constant 0 : i32
    return %arg0, %c0_i32, %c0_i32_0 : i32, i32, i32
  }
}

</mosaic_0001>

<bundles_post_ra>
// kernel: tpu_custom_call.1
= control target key start
LH: loop header
LB: loop body
LE: loop exit
PB: predicated region body
PF: predicated region fallthrough
CT: control target
= control target key end

     0   :  { %9 = vsyncpa [#allocation4], 0  ;;  %s2945_s0 = inlined_call_operand.hbm [shape: bf16[2,16,128], index: 0, kind: input, shape index: {}]   ;;  %s2946_s1 = inlined_call_operand.hbm [shape: bf16[128,384], index: 1, kind: input, shape index: {}]   ;;  %s2947_s2 = inlined_call_operand.hbm [shape: bf16[128,128], index: 2, kind: input, shape index: {}]   ;;  %s2948_s3 = inlined_call_operand.vmem [shape: f32[1,128], index: 3, kind: input, shape index: {}]   ;;  %s2949_s4 = inlined_call_operand.hbm [shape: f32[2,16,128], index: 4, kind: output, shape index: {}]  }
   0x1   :  { %11 = vsyncpa [#allocation4 + $0x1], 0 }
   0x2   :  { %12 = vsyncpa [#allocation7], 0 }
   0x3   :  { %13 = vsyncpa [#allocation5], 0 }
   0x4   :  { %15 = vsyncpa [#allocation5 + $0x1], 0  ;;  %s2483_s15 = smov 0   ;;  %s2485_s16 = smov 0  }
   0x5   :  { %s2487_s17 = smov 0   ;;  %s2489_s18 = smov 0  }
   0x6 LB: > { %s2504_s19 = sadd.s32 4294967295, %s2436_s18   ;;  %s1810_s20 = sadd.s32 4294967294, %s2436_s18   ;;  %s2436_s18 = sphi %s2489_s18, %s2971_s18   ;;  %s2432_s17 = sphi %s2487_s17, %s2970_s17   ;;  %s2428_s16 = sphi %s2485_s16, %s2969_s16   ;;  %s2424_s15 = sphi %s2483_s15, %s2968_s15  }
   0x7   : > { %p41_p0 = scmp.ne.s32.totalorder %s2428_s16, %s2424_s15  ;;  %p2950_p1 = scmp.eq.s32.totalorder %s2504_s19, 0 }
   0x8   : > { %p134_p3 = scmp.eq.s32.totalorder %s1810_s20, 1  ;;  %p1811_p5 = scmp.ge.s32.totalorder %s2436_s18, 1 }
   0x9   : > { %p2513_p4 = por %p2950_p1, %p41_p0  ;;  %p141_p7 = scmp.lt.s32.totalorder %s2436_s18, 3 }
   0xa   : > { %p2518_p6 = por %p134_p3, %p41_p0  ;;  %s2438_s24 = smov [#allocation6]  }
   0xb   : > { %s2954_s21 = scalar_select %p2513_p4, 1, 0 }
   0xc   : > { %s2955_s22 = scalar_select %p2518_p6, 1, 0 }
   0xd   : > { %p2523_p8 = pnand %p1811_p5, %p141_p7  ;;  %s153_s25 = sshll.u32 %s2438_s24, 4  ;;  %s154_s25 = int_to_ptr.vmem [resolvable:$true] %s153_s25 }
   0xe   : > { %s2439_s27 = smov [#allocation8]   ;;  %s2299_s29 = scalar_lea.vmem %s154_s25, 3072 }
   0xf   : > { %s2956_s23 = scalar_select %p2523_p8, 1, 0 }
  0x10   : > { %p2111_p9 = pneg %p2523_p8  ;;  %s166_s28 = sshll.u32 %s2439_s27, 4  ;;  %s167_s28 = int_to_ptr.vmem [resolvable:$true] %s166_s28 }
  0x11   : > { %p2300_p13 = scmp.ne.s32.totalorder %s154_s25, %s2299_s29  ;;  %p2307_p5 = scmp.lt.s32.totalorder %s154_s25, %s154_s25 }
  0x12   : > { %p2532_p11 = pnand %p2111_p9, %p2950_p1  ;;  %p2308_p7 = scmp.lt.s32.totalorder %s2299_s29, %s2299_s29 }
  0x14   : > { %p2290_p12 = pneg %p2532_p11  ;;  %p2309_p10 = por %p2308_p7, %p2307_p5 }
  0x16   : > { %p2302_p0 = pnand %p2300_p13, %p2290_p12 }
  0x18   : > { %p2303_p3 = pneg %p2302_p0 }
  0x1a   : > { %p2310_p9 = pnand %p2309_p10, %p2303_p3 }
  0x1c   : > { %2313 = shalt.err (!%p2310_p9)
}
  0x1d   : > { %s2440_s30 = smov 192   ;;  %s2441_s5 = smov 12  }
  0x1e   : > { %2114 = dma.hbm_to_vmem [thread:$0]  (!%p2532_p11), %s2946_s1, 3072, %s154_s25, [#allocation7], %s2440_s30, %s2440_s30, %s2441_s5  }
  0x1f   : > { %s2325_s8 = scalar_lea.vmem %s167_s28, 1024  ;;  %p2333_p2 = scmp.lt.s32.totalorder %s167_s28, %s167_s28 }
  0x20   : > { %p2326_p1 = scmp.ne.s32.totalorder %s167_s28, %s2325_s8  ;;  %p2334_p6 = scmp.lt.s32.totalorder %s2325_s8, %s2325_s8 }
  0x22   : > { %p2328_p13 = pnand %p2326_p1, %p2290_p12  ;;  %p2335_p5 = por %p2334_p6, %p2333_p2 }
  0x24   : > { %p2329_p0 = pneg %p2328_p13 }
  0x26   : > { %p2336_p10 = pnand %p2335_p5, %p2329_p0 }
  0x28   : > { %2339 = shalt.err (!%p2336_p10)
}
  0x29   : > { %s2442_s9 = smov 64   ;;  %s2443_s10 = smov 4  }
  0x2a   : > { %2117 = dma.hbm_to_vmem [thread:$0]  (!%p2532_p11), %s2947_s2, 1024, %s167_s28, [#allocation7], %s2442_s9, %s2442_s9, %s2443_s10  }
  0x2b   : > { %s2558_s13 = sadd.s32 1, %s2436_s18   ;;  %s28_s20 = sadd.s32 1, %s2432_s17 }
  0x2c   : > { %s25_s14 = ssub.s32 %s2436_s18, %s2558_s13  ;;  %p35_p2 = scmp.ne.s32.totalorder %s2432_s17, %s2428_s16 }
  0x2d   : > { %p26_p1 = scmp.eq.s32.totalorder %s25_s14, 0  ;;  %p36_p6 = scmp.eq.s32.totalorder %s2436_s18, 0 }
  0x2e   : > { %p2958_p3 = scmp.eq.s32.totalorder %s2504_s19, 1  ;;  %p2128_p9 = scmp.lt.s32.totalorder %s2436_s18, 2 }
  0x2f   : > { %s2567_s24 = scalar_select %p26_p1, %s2432_s17, %s28_s20  }
  0x30   : > { %p37_p12 = por %p36_p6, %p35_p2  ;;  %p2571_p7 = por %p2958_p3, %p35_p2 }
  0x31   : > { %s183_s26 = sand.u32 1, %s2432_s17   ;;  %s1895_s28 = sshll.u32 %s2436_s18, 7 }
  0x32   : > { %s2959_s25 = scalar_select %p2571_p7, 1, 0 }
  0x33   : > { %s1815_s27 = sshll.u32 %s183_s26, 3  ;;  %s2581_s5 = scalar_lea.hbm %s2945_s0, %s1895_s28 }
  0x34   : > { %s187_s6 = scalar_lea.vmem [#allocation3], %s1815_s27  ;;  %p2585_p11 = pnand %p2128_p9, %p37_p12 }
  0x35   : > { %s194_s7 = sshll.u32 %s187_s6, 4  ;;  %s2589_s11 = scalar_lea.sflag [#allocation4], %s183_s26  ;;  %s2583_s7 = int_to_ptr.vmem [resolvable:$true] %s194_s7 }
  0x36   : > { %s2340_s12 = scalar_lea.hbm %s2581_s5, 128  ;;  %p2342_p0 = pneg %p2585_p11 }
  0x37   : > { %p2341_p13 = scmp.ne.s32.totalorder %s2581_s5, %s2340_s12  ;;  %s2345_s27 = scalar_lea.hbm %s2945_s0, 256 }
  0x38   : > { %p2346_p1 = scmp.lt.s32.totalorder %s2581_s5, %s2945_s0  ;;  %p2347_p2 = scmp.lt.s32.totalorder %s2345_s27, %s2340_s12 }
  0x39   : > { %p2343_p5 = pnand %p2342_p0, %p2341_p13 }
  0x3a   : > { %p2348_p6 = por %p2347_p2, %p2346_p1 }
  0x3b   : > { %p2344_p10 = pneg %p2343_p5 }
  0x3d   : > { %p2349_p12 = pnand %p2348_p6, %p2344_p10 }
  0x3f   : > { %2352 = shalt.err (!%p2349_p12)
}
  0x40   : > { %s2353_s26 = scalar_lea.vmem %s2583_s7, 128  ;;  %s2444_s30 = smov [#allocation3]  }
  0x41   : > { %p2354_p3 = scmp.ne.s32.totalorder %s2583_s7, %s2353_s26  ;;  %s2358_s6 = sshll.u32 %s2444_s30, 4  ;;  %s2359_s6 = int_to_ptr.vmem [resolvable:$false] %s2358_s6 }
  0x42   : > { %s2360_s14 = scalar_lea.vmem %s2359_s6, 256  ;;  %p2361_p5 = scmp.lt.s32.totalorder %s2583_s7, %s2359_s6 }
  0x43   : > { %p2356_p9 = pnand %p2354_p3, %p2342_p0  ;;  %p2362_p7 = scmp.lt.s32.totalorder %s2360_s14, %s2353_s26 }
  0x45   : > { %p2357_p13 = pneg %p2356_p9  ;;  %p2363_p4 = por %p2362_p7, %p2361_p5 }
  0x47   : > { %p2364_p8 = pnand %p2363_p4, %p2357_p13 }
  0x49   : > { %2367 = shalt.err (!%p2364_p8)
}
  0x4a   : > { %2121 = dma.hbm_to_vmem [thread:$0]  (!%p2585_p11), %s2581_s5, 128, %s2583_s7, %s2589_s11, %s2442_s9, %s2442_s9, %s2443_s10  }
  0x4b   : > { %p2961_p0 = scmp.ne.s32.totalorder %s2956_s23, 0 }
  0x4c   : > { %s2616_s12 = sand.u32 (!%p2961_p0), 1, %s2428_s16   ;;  %p2962_p4 = scmp.ne.s32.totalorder (!%p2961_p0), %s2954_s21, 0 }
  0x4d   : > { %206 = sbr.rel (%p2961_p0) target bundleno = 1670 (0x686), region = 36  ;;  %s1819_s20 = sshll.u32 (!%p2961_p0), %s2616_s12, 3 }
  0x4e   : > { %s209_s27 = scalar_lea.sflag (!%p2961_p0), [#allocation4], %s2616_s12  ;;  %s2620_s28 = scalar_lea.vmem (!%p2961_p0), [#allocation3], %s1819_s20 }
  0x52   : > { %2411 = dma.done.wait (%p2962_p4), %s209_s27, 128  }
  0x53   : > { %2413 = vsyncadd (%p2962_p4), %s209_s27, 4294967168  ;;  %p2963_p8 = scmp.eq.s32.totalorder %s2504_s19, 0 }
  0x55   : > { %2415 = dma.done.wait (%p2963_p8), [#allocation7], 4096   ;;  %p2964_p7 = pmov %p2963_p8 }
  0x56   : > { %v2445_v0 = vmov 0   ;;  %v2446_v1 = vmov 0.0   ;;  %v2182_v2 = vld [vmem:[#allocation6 + $0xac] ss:$12 sps:$4 sm:$0xff]   ;;  %v2184_v3 = vld [vmem:[#allocation6 + $0xa8] ss:$12 sps:$4 sm:$0xff]  }
  0x57   : > { %2417 = vsyncadd (%p2964_p7), [#allocation7], 4294963200  ;;  %446 = vmatprep.mubr.bf16.mxu0 %v2445_v0  ;;  %1963 = vmatprep.subr.bf16.mxu1 %v2446_v1  ;;  %v2185_v4 = vld [vmem:[#allocation6 + $0x94] ss:$12 sps:$4 sm:$0xff]   ;;  %v2187_v5 = vld [vmem:[#allocation6 + $0x90] ss:$12 sps:$4 sm:$0xff]  }
  0x58   : > { %414 = vmatprep.subr.bf16.mxu0 %v2182_v2  ;;  %v2188_v6 = vld [vmem:[#allocation6 + $0x7c] ss:$12 sps:$4 sm:$0xff]   ;;  %v2190_v7 = vld [vmem:[#allocation6 + $0x78] ss:$12 sps:$4 sm:$0xff]   ;;  %v2193_v9 = vld [vmem:[#allocation6 + $0x60] ss:$12 sps:$4 sm:$0xff]  }
  0x59   : > { %415 = vmatpush1.bf16.msra.mxu0 %v2184_v3  ;;  %v2191_v8 = vld [vmem:[#allocation6 + $0x64] ss:$12 sps:$4 sm:$0xff]   ;;  %v2194_v10 = vld [vmem:[#allocation6 + $0x4c] ss:$12 sps:$4 sm:$0xff]   ;;  %v2196_v13 = vld [vmem:[#allocation6 + $0x48] ss:$12 sps:$4 sm:$0xff]  }
  0x5a   : > { %416 = vmatprep.subr.bf16.mxu0 %v2185_v4  ;;  %v2207_v11 = vld [vmem:[#allocation6 + $0xb0] ss:$12 sps:$4 sm:$0xff]   ;;  %v2208_v12 = vld [vmem:[#allocation6 + $0x98] ss:$12 sps:$4 sm:$0xff]   ;;  %v2197_v14 = vld [vmem:[#allocation6 + $0x34] ss:$12 sps:$4 sm:$0xff]  }
  0x5b   : > { %1964 = vmatpush3.bf16.msra.mxu1 %v2207_v11  ;;  %v2199_v15 = vld [vmem:[#allocation6 + $0x30] ss:$12 sps:$4 sm:$0xff]   ;;  %v2209_v17 = vld [vmem:[#allocation6 + $0x80] ss:$12 sps:$4 sm:$0xff]   ;;  %v2210_v18 = vld [vmem:[#allocation6 + $0x68] ss:$12 sps:$4 sm:$0xff]  }
  0x5c   : > { %1965 = vmatprep.subr.bf16.mxu1 %v2446_v1  ;;  %v2200_v16 = vld [vmem:[#allocation6 + $0x1c] ss:$12 sps:$4 sm:$0xff]   ;;  %v2202_v19 = vld [vmem:[#allocation6 + $0x18] ss:$12 sps:$4 sm:$0xff]   ;;  %v2205_v22 = vld [vmem:[#allocation6] ss:$12 sps:$4 sm:$0xff]  }
  0x5d   : > { %417 = vmatpush1.bf16.msra.mxu0 %v2187_v5  ;;  %v2203_v20 = vld [vmem:[#allocation6 + $0x4] ss:$12 sps:$4 sm:$0xff]   ;;  %v2213_v25 = vld [vmem:[#allocation6 + $0x20] ss:$12 sps:$4 sm:$0xff]   ;;  %v2214_v26 = vld [vmem:[#allocation6 + $0x8] ss:$12 sps:$4 sm:$0xff]  }
  0x5e   : > { %418 = vmatprep.subr.bf16.mxu0 %v2188_v6  ;;  %v2211_v21 = vld [vmem:[#allocation6 + $0x50] ss:$12 sps:$4 sm:$0xff]   ;;  %v2212_v24 = vld [vmem:[#allocation6 + $0x38] ss:$12 sps:$4 sm:$0xff]   ;;  %vm2447_vm0 = vmmov 0   ;;  %vm501_vm1 = vcmask 130048  }
  0x5f   : > { %1966 = vmatpush3.bf16.msra.mxu1 %v2208_v12  ;;  %v2206_v23 = vld [vmem:[%s2620_s28] sm:$0xff]   ;;  %1979 = vmatprep.mubr.msk.bf16.mxu1 %vm2447_vm0, %v2446_v1  ;;  %s2448_s21 = smov 112   ;;  %s2449_s23 = smov 96   ;;  %vm624_vm2 = vcmask 125952   ;;  %vm763_vm3 = vcmask 257152   ;;  %vm899_vm4 = vcmask 388352  }
  0x60   : > { %1967 = vmatprep.subr.bf16.mxu1 %v2446_v1  ;;  %s2450_s9 = smov 80   ;;  %s2451_s10 = smov 64   ;;  %vm1035_vm5 = vcmask 519552   ;;  %vm1171_vm6 = vcmask 650752   ;;  %vm1307_vm7 = vcmask 781952   ;;  %vm1443_vm8 = vcmask 913152  }
  0x61   : > { %419 = vmatpush1.bf16.msra.mxu0 %v2190_v7  ;;  %s2452_s5 = smov 48   ;;  %s2453_s7 = smov 32   ;;  %vm1579_vm9 = vcmask 1044352  }
  0x62   : > { %420 = vmatprep.subr.bf16.mxu0 %v2191_v8  ;;  %s2454_s8 = smov 16   ;;  %s1822_s11 = sshll.u32 %s2616_s12, 4 }
  0x63   : > { %1968 = vmatpush3.bf16.msra.mxu1 %v2209_v17  ;;  %s244_s30 = scalar_lea.vmem [#allocation9], %s1822_s11  ;;  %s1912_s14 = sshll.u32 %s2504_s19, 8 }
  0x64   : > { %1969 = vmatprep.subr.bf16.mxu1 %v2446_v1  ;;  %s1718_s6 = sshll.u32 %s244_s30, 4  ;;  %s2902_s28 = scalar_lea.hbm %s2949_s4, %s1912_s14  ;;  %s2897_s6 = int_to_ptr.vmem [resolvable:$true] %s1718_s6 }
  0x65   : > { %421 = vmatpush1.bf16.msra.mxu0 %v2193_v9  ;;  %p2965_p10 = scmp.ne.s32.totalorder %s2959_s25, 0  ;;  %s2455_s19 = smov [#allocation9]  }
  0x66   : > { %422 = vmatprep.subr.bf16.mxu0 %v2194_v10 }
  0x67   : > { %1970 = vmatpush3.bf16.msra.mxu1 %v2210_v18 }
  0x68   : > { %1971 = vmatprep.subr.bf16.mxu1 %v2446_v1 }
  0x69   : > { %423 = vmatpush1.bf16.msra.mxu0 %v2196_v13 }
  0x6a   : > { %424 = vmatprep.subr.bf16.mxu0 %v2197_v14 }
  0x6b   : > { %1972 = vmatpush3.bf16.msra.mxu1 %v2211_v21 }
  0x6c   : > { %1973 = vmatprep.subr.bf16.mxu1 %v2446_v1 }
  0x6d   : > { %425 = vmatpush1.bf16.msra.mxu0 %v2199_v15 }
  0x6e   : > { %426 = vmatprep.subr.bf16.mxu0 %v2200_v16 }
  0x6f   : > { %1974 = vmatpush3.bf16.msra.mxu1 %v2212_v24 }
  0x70   : > { %1975 = vmatprep.subr.bf16.mxu1 %v2446_v1 }
  0x71   : > { %427 = vmatpush1.bf16.msra.mxu0 %v2202_v19 }
  0x72   : > { %428 = vmatprep.subr.bf16.mxu0 %v2203_v20 }
  0x73   : > { %1976 = vmatpush3.bf16.msra.mxu1 %v2213_v25 }
  0x74   : > { %1977 = vmatprep.subr.bf16.mxu1 %v2446_v1 }
  0x75   : > { %429 = vmatpush1.bf16.msra.mxu0 %v2205_v22 }
  0x76   : > { %2007 = vmatprep.subr.bf16.mxu0 %v2446_v1 }
  0x77   : > { %1978 = vmatpush3.bf16.msra.mxu1 %v2214_v26 }
  0x78   : > { %447 = vmatmul.mubr.bf16.vlgmr.msra.gmra.mxu0 %v2206_v23  ;;  %1983 = vmatprep.subr.bf16.mxu1 %v2446_v1 }
  0x79   : > { %2009 = vmatprep.mubr.msk.bf16.mxu0 %vm2447_vm0, %v2446_v1 }
  0x7a   : > { %1980 = vmatmul.mubr.bf16.vlgmr.msra.gmra.mxu1 %v2206_v23 }
  0x7b   : > { %1985 = vmatprep.mubr.msk.bf16.mxu1 %vm2447_vm0, %v2446_v1 }
 0x138   : > { %v448_v27 = vpop.f32.mrf.mxu0 }
 0x13a   : > { %v450_v28 = vpop.f32.mrf.mxu0  ;;  %v491_v34 = vpop.f32.mrf.mxu1 }
 0x13c   : > { %v452_v29 = vpop.f32.mrf.mxu0  ;;  %v1981_v35 = vpop.f32.mrf.mxu1 }
 0x13d   : > { %v498_v33 = vpack.c.bf16 %v452_v29, %v448_v27 }
 0x13e   : > { %v454_v30 = vpop.f32.mrf.mxu0  ;;  %v494_v36 = vpop.f32.mrf.mxu1 }
 0x13f   : > { %v499_v31 = vpack.c.bf16 %v454_v30, %v450_v28  ;;  %v2662_v37 = vpack.c.bf16 %v494_v36, %v491_v34 }
 0x140   : > { %v1982_v38 = vpop.f32.mrf.mxu1 }
 0x141   : > { %631 = vrot.lane.b32.xlu1 %v499_v31, %s2448_s21  ;;  %v506_v32 = vsel %vm501_vm1, %v499_v31, 0 }
 0x142   : > { %1984 = vmatpush3.bf16.xpose.msra.mxu1 %v506_v32 }
 0x143   : > { %1989 = vmatprep.subr.bf16.mxu1 %v2446_v1 }
 0x145   : > { %628 = vrot.lane.b32.xlu1 %v498_v33, %s2448_s21 }
 0x149   : > { %766 = vrot.lane.b32.xlu1 %v498_v33, %s2449_s23  ;;  %1986 = vmatmul.mubr.msk.bf16.vlgmr.msra.gmra.mxu1 %vm501_vm1, %v498_v33 }
 0x14a   : > { %1991 = vmatprep.mubr.msk.bf16.mxu1 %vm2447_vm0, %v2446_v1  ;;  %1990 = vmatpush3.bf16.msra.mxu1 %v2662_v37 }
 0x14b   : > { %1995 = vmatprep.subr.bf16.mxu1 %v2446_v1 }
 0x14d   : > { %904 = vrot.lane.b32.xlu1 %v499_v31, %s2450_s9 }
 0x151   : > { %902 = vrot.lane.b32.xlu1 %v498_v33, %s2450_s9 }
 0x155   : > { %1040 = vrot.lane.b32.xlu1 %v499_v31, %s2451_s10 }
 0x159   : > { %1038 = vrot.lane.b32.xlu1 %v498_v33, %s2451_s10 }
 0x15d   : > { %1176 = vrot.lane.b32.xlu1 %v499_v31, %s2452_s5 }
 0x161   : > { %1312 = vrot.lane.b32.xlu1 %v499_v31, %s2453_s7 }
 0x165   : > { %1448 = vrot.lane.b32.xlu1 %v499_v31, %s2454_s8 }
 0x1b3   : > { %v632_v45 = vpop.permute.xlu1 %631 }
 0x1b4   : > { %v637_v0 = vsel %vm501_vm1, %v632_v45, 0 }
 0x1b7   : > { %v629_v46 = vpop.permute.xlu1 %628 }
 0x1bb   : > { %v767_v47 = vpop.permute.xlu1 %766 }
 0x1bf   : > { %v905_v53 = vpop.permute.xlu1 %904 }
 0x1c0   : > { %v910_v58 = vsel %vm501_vm1, %v905_v53, 0 }
 0x1c3   : > { %v903_v57 = vpop.permute.xlu1 %902 }
 0x1c7   : > { %v1041_v59 = vpop.permute.xlu1 %1040 }
 0x1c8   : > { %v1046_v2 = vsel %vm501_vm1, %v1041_v59, 0 }
 0x1cb   : > { %v1039_v63 = vpop.permute.xlu1 %1038 }
 0x1cf   : > { %v1177_v3 = vpop.permute.xlu1 %1176 }
 0x1d0   : > { %v1182_v4 = vsel %vm501_vm1, %v1177_v3, 0 }
 0x1d3   : > { %v1313_v5 = vpop.permute.xlu1 %1312 }
 0x1d4   : > { %v1318_v7 = vsel %vm501_vm1, %v1313_v5, 0 }
 0x1d7   : > { %v1449_v8 = vpop.permute.xlu1 %1448 }
 0x1d8   : > { %v1454_v10 = vsel %vm501_vm1, %v1449_v8, 0 }
 0x209   : > { %v542_v39 = vpop.f32.mrf.mxu1 }
 0x20a   : > { %v549_v40 = vsel %vm501_vm1, %v542_v39, -inf }
 0x20b   : > { %550 = vmax.xlane.f32.xlu0 %v549_v40  ;;  %v1987_v41 = vpop.f32.mrf.mxu1 }
 0x20d   : > { %v545_v42 = vpop.f32.mrf.mxu1 }
 0x20e   : > { %v552_v43 = vsel %vm501_vm1, %v545_v42, -inf }
 0x20f   : > { %553 = vmax.xlane.f32.xlu0 %v552_v43  ;;  %v1988_v44 = vpop.f32.mrf.mxu1 }
 0x225   : > { %768 = vrot.lane.b32.xlu0 %v499_v31, %s2449_s23 }
 0x229   : > { %1174 = vrot.lane.b32.xlu0 %v498_v33, %s2452_s5 }
 0x22d   : > { %1310 = vrot.lane.b32.xlu0 %v498_v33, %s2453_s7 }
 0x231   : > { %1446 = vrot.lane.b32.xlu0 %v498_v33, %s2454_s8 }
 0x294   : > { %v551_v48 = vpop.xlane.xlu0 %550 }
 0x295   : > { %v555_v49 = vsub.f32 %v542_v39, %v551_v48 }
 0x297   : > { %v557_v50 = vmul.f32 1.442695, %v555_v49 }
 0x298   : > { %v554_v51 = vpop.xlane.xlu0 %553 }
 0x299   : > { %v556_v52 = vsub.f32 %v545_v42, %v554_v51  ;;  %2224 = vpow2.f32 %v557_v50 }
 0x29b   : > { %v559_v54 = vmul.f32 1.442695, %v556_v52 }
 0x29c   : > { %v769_v55 = vpop.permute.xlu0 %768 }
 0x29d   : > { %2226 = vpow2.f32 %v559_v54  ;;  %v774_v56 = vsel %vm501_vm1, %v769_v55, 0 }
 0x29e   : > { %2008 = vmatpush3.bf16.xpose.msra.mxu0 %v774_v56 }
 0x29f   : > { %2019 = vmatprep.subr.bf16.mxu0 %v2446_v1 }
 0x2a0   : > { %v1175_v6 = vpop.permute.xlu0 %1174 }
 0x2a4   : > { %v1311_v9 = vpop.permute.xlu0 %1310 }
 0x2a5   : > { %2010 = vmatmul.mubr.msk.bf16.vlgmr.msra.gmra.mxu0 %vm501_vm1, %v767_v47 }
 0x2a6   : > { %2020 = vmatpush3.bf16.xpose.msra.mxu0 %v910_v58  ;;  %2021 = vmatprep.mubr.msk.bf16.mxu0 %vm2447_vm0, %v2446_v1  ;;  %v2679_v60 = vpop.eup %2224 }
 0x2a7   : > { %2031 = vmatprep.subr.bf16.mxu0 %v2446_v1 }
 0x2a8   : > { %v1447_v11 = vpop.permute.xlu0 %1446 }
 0x2aa   : > { %v2681_v61 = vpop.eup %2226 }
 0x2ab   : > { %v567_v62 = vpack.c.bf16 %v2681_v61, %v2679_v60 }
 0x2ad   : > { %1992 = vmatmul.mubr.msk.bf16.vlgmr.msra.gmra.mxu1 %vm501_vm1, %v567_v62  ;;  %2022 = vmatmul.mubr.msk.bf16.vlgmr.msra.gmra.mxu0 %vm501_vm1, %v903_v57 }
 0x2ae   : > { %1996 = vmatpush3.bf16.xpose.msra.mxu1 %v637_v0  ;;  %2032 = vmatpush3.bf16.xpose.msra.mxu0 %v1046_v2 }
 0x2af   : > { %1997 = vmatprep.mubr.msk.bf16.mxu1 %vm2447_vm0, %v2446_v1  ;;  %2033 = vmatprep.mubr.msk.bf16.mxu0 %vm2447_vm0, %v2446_v1 }
 0x2b0   : > { %2043 = vmatprep.subr.bf16.mxu0 %v2446_v1  ;;  %2001 = vmatprep.subr.bf16.mxu1 %v2446_v1 }
 0x2b5   : > { %1998 = vmatmul.mubr.msk.bf16.vlgmr.msra.gmra.mxu1 %vm501_vm1, %v629_v46  ;;  %2034 = vmatmul.mubr.msk.bf16.vlgmr.msra.gmra.mxu0 %vm501_vm1, %v1039_v63 }
 0x2b6   : > { %2044 = vmatpush3.bf16.xpose.msra.mxu0 %v1182_v4  ;;  %2045 = vmatprep.mubr.msk.bf16.mxu0 %vm2447_vm0, %v2446_v1 }
 0x2b7   : > { %2055 = vmatprep.subr.bf16.mxu0 %v2446_v1  ;;  %2003 = vmatprep.mubr.msk.bf16.mxu1 %vm2447_vm0, %v2446_v1 }
 0x2bd   : > { %2046 = vmatmul.mubr.msk.bf16.vlgmr.msra.gmra.mxu0 %vm501_vm1, %v1175_v6 }
 0x2be   : > { %2056 = vmatpush3.bf16.xpose.msra.mxu0 %v1318_v7  ;;  %2057 = vmatprep.mubr.msk.bf16.mxu0 %vm2447_vm0, %v2446_v1 }
 0x2bf   : > { %2067 = vmatprep.subr.bf16.mxu0 %v2446_v1 }
 0x2c5   : > { %2058 = vmatmul.mubr.msk.bf16.vlgmr.msra.gmra.mxu0 %vm501_vm1, %v1311_v9 }
 0x2c6   : > { %2068 = vmatpush3.bf16.xpose.msra.mxu0 %v1454_v10  ;;  %2069 = vmatprep.mubr.msk.bf16.mxu0 %vm2447_vm0, %v2446_v1 }
 0x2c7   : > { %2079 = vmatprep.subr.bf16.mxu0 %v2446_v1 }
 0x2cd   : > { %2070 = vmatmul.mubr.msk.bf16.vlgmr.msra.gmra.mxu0 %vm501_vm1, %v1447_v11 }
 0x2ce   : > { %2095 = vmatprep.mubr.msk.bf16.mxu0 %vm2447_vm0, %v2446_v1 }
 0x365   : > { %v2716_v12 = vpop.f32.mrf.mxu0 }
 0x366   : > { %v817_v13 = vsel %vm501_vm1, %v2716_v12, -inf }
 0x367   : > { %818 = vmax.xlane.f32.xlu0 %v817_v13  ;;  %v2011_v14 = vpop.f32.mrf.mxu0 }
 0x369   : > { %v2720_v15 = vpop.f32.mrf.mxu0 }
 0x36a   : > { %v820_v16 = vsel %vm501_vm1, %v2720_v15, -inf }
 0x36b   : > { %821 = vmax.xlane.f32.xlu1 %v820_v16  ;;  %v2012_v17 = vpop.f32.mrf.mxu0 }
 0x36d   : > { %v2724_v18 = vpop.f32.mrf.mxu1  ;;  %v2726_v19 = vpop.f32.mrf.mxu0 }
 0x36e   : > { %v953_v20 = vsel %vm501_vm1, %v2726_v19, -inf }
 0x36f   : > { %954 = vmax.xlane.f32.xlu0 %v953_v20  ;;  %v1993_v21 = vpop.f32.mrf.mxu1  ;;  %v2023_v22 = vpop.f32.mrf.mxu0 }
 0x371   : > { %v2730_v23 = vpop.f32.mrf.mxu1  ;;  %v2732_v24 = vpop.f32.mrf.mxu0 }
 0x372   : > { %v956_v25 = vsel %vm501_vm1, %v2732_v24, -inf }
 0x373   : > { %957 = vmax.xlane.f32.xlu1 %v956_v25  ;;  %v1994_v26 = vpop.f32.mrf.mxu1  ;;  %v2024_v27 = vpop.f32.mrf.mxu0 }
 0x375   : > { %v2736_v28 = vpop.f32.mrf.mxu1  ;;  %v2738_v29 = vpop.f32.mrf.mxu0 }
 0x376   : > { %v1089_v30 = vsel %vm501_vm1, %v2738_v29, -inf  ;;  %v680_v41 = vsel %vm501_vm1, %v2736_v28, -inf }
 0x377   : > { %1090 = vmax.xlane.f32.xlu0 %v1089_v30  ;;  %v1999_v31 = vpop.f32.mrf.mxu1  ;;  %v2035_v32 = vpop.f32.mrf.mxu0 }
 0x379   : > { %v2742_v33 = vpop.f32.mrf.mxu1  ;;  %v2744_v34 = vpop.f32.mrf.mxu0 }
 0x37a   : > { %v1092_v35 = vsel %vm501_vm1, %v2744_v34, -inf  ;;  %v683_v36 = vsel %vm501_vm1, %v2742_v33, -inf }
 0x37b   : > { %1093 = vmax.xlane.f32.xlu1 %v1092_v35  ;;  %v2036_v38 = vpop.f32.mrf.mxu0  ;;  %684 = vmax.xlane.f32.xlu0 %v683_v36  ;;  %v2000_v39 = vpop.f32.mrf.mxu1 }
 0x37d   : > { %v2750_v40 = vpop.f32.mrf.mxu0 }
 0x37e   : > { %v1225_v44 = vsel %vm501_vm1, %v2750_v40, -inf }
 0x37f   : > { %v2047_v42 = vpop.f32.mrf.mxu0  ;;  %681 = vmax.xlane.f32.xlu1 %v680_v41 }
 0x381   : > { %v2754_v43 = vpop.f32.mrf.mxu0 }
 0x382   : > { %v1228_v47 = vsel %vm501_vm1, %v2754_v43, -inf }
 0x383   : > { %v2048_v45 = vpop.f32.mrf.mxu0  ;;  %1226 = vmax.xlane.f32.xlu1 %v1225_v44 }
 0x385   : > { %v2758_v46 = vpop.f32.mrf.mxu0 }
 0x386   : > { %v1361_v55 = vsel %vm501_vm1, %v2758_v46, -inf }
 0x387   : > { %v2059_v48 = vpop.f32.mrf.mxu0  ;;  %1229 = vmax.xlane.f32.xlu1 %v1228_v47 }
 0x389   : > { %v2762_v49 = vpop.f32.mrf.mxu0 }
 0x38a   : > { %v1364_v56 = vsel %vm501_vm1, %v2762_v49, -inf }
 0x38b   : > { %v2060_v50 = vpop.f32.mrf.mxu0 }
 0x38d   : > { %v2764_v51 = vpop.f32.mrf.mxu0 }
 0x38e   : > { %v1497_v57 = vsel %vm501_vm1, %v2764_v51, -inf }
 0x38f   : > { %v2071_v52 = vpop.f32.mrf.mxu0 }
 0x391   : > { %v2766_v53 = vpop.f32.mrf.mxu0  ;;  %700 = vrot.lane.b32.xlu0 %v2662_v37, %s2448_s21 }
 0x392   : > { %v1500_v58 = vsel %vm501_vm1, %v2766_v53, -inf }
 0x393   : > { %v2072_v54 = vpop.f32.mrf.mxu0 }
 0x398   : > { %836 = vrot.lane.b32.xlu1 %v2662_v37, %s2449_s23 }
 0x3b0   : > { %1362 = vmax.xlane.f32.xlu0 %v1361_v55 }
 0x3bc   : > { %1365 = vmax.xlane.f32.xlu1 %v1364_v56 }
 0x3c0   : > { %1498 = vmax.xlane.f32.xlu1 %v1497_v57 }
 0x3c4   : > { %1501 = vmax.xlane.f32.xlu1 %v1500_v58 }
 0x3c6   : > { %972 = vrot.lane.b32.xlu0 %v2662_v37, %s2450_s9 }
 0x3ca   : > { %1244 = vrot.lane.b32.xlu0 %v2662_v37, %s2452_s5 }
 0x3ce   : > { %1380 = vrot.lane.b32.xlu0 %v2662_v37, %s2453_s7 }
 0x3d2   : > { %1516 = vrot.lane.b32.xlu0 %v2662_v37, %s2454_s8 }
 0x3d5   : > { %1108 = vrot.lane.b32.xlu1 %v2662_v37, %s2451_s10 }
 0x3f0   : > { %v819_v59 = vpop.xlane.xlu0 %818 }
 0x3f1   : > { %v823_v62 = vsub.f32 %v2716_v12, %v819_v59 }
 0x3f3   : > { %v825_v63 = vmul.f32 1.442695, %v823_v62 }
 0x3f4   : > { %v822_v0 = vpop.xlane.xlu1 %821 }
 0x3f5   : > { %2228 = vpow2.f32 %v825_v63  ;;  %v824_v2 = vsub.f32 %v2720_v15, %v822_v0 }
 0x3f7   : > { %v827_v3 = vmul.f32 1.442695, %v824_v2 }
 0x3f8   : > { %v955_v4 = vpop.xlane.xlu0 %954 }
 0x3f9   : > { %2230 = vpow2.f32 %v827_v3  ;;  %v959_v5 = vsub.f32 %v2726_v19, %v955_v4 }
 0x3fb   : > { %v961_v6 = vmul.f32 1.442695, %v959_v5 }
 0x3fc   : > { %v958_v7 = vpop.xlane.xlu1 %957 }
 0x3fd   : > { %2232 = vpow2.f32 %v961_v6  ;;  %v960_v8 = vsub.f32 %v2732_v24, %v958_v7 }
 0x3ff   : > { %v963_v9 = vmul.f32 1.442695, %v960_v8 }
 0x400   : > { %v1091_v37 = vpop.xlane.xlu0 %1090 }
 0x401   : > { %2234 = vpow2.f32 %v963_v9  ;;  %v1095_v10 = vsub.f32 %v2738_v29, %v1091_v37 }
 0x402   : > { %v2795_v11 = vpop.eup %2228 }
 0x403   : > { %v1097_v12 = vmul.f32 1.442695, %v1095_v10  ;;  %v829_v13 = vsel %vm501_vm1, %v2795_v11, 0.0 }
 0x404   : > { %v1094_v14 = vpop.xlane.xlu1 %1093  ;;  %830 = vadd.xlane.f32.xlu0 %v829_v13  ;;  %v685_v15 = vpop.xlane.xlu0 %684 }
 0x405   : > { %2236 = vpow2.f32 %v1097_v12  ;;  %v1096_v16 = vsub.f32 %v2744_v34, %v1094_v14  ;;  %v687_v17 = vsub.f32 %v2742_v33, %v685_v15 }
 0x406   : > { %v2231_v19 = vpop.eup %2230 }
 0x407   : > { %v1099_v20 = vmul.f32 1.442695, %v1096_v16  ;;  %v832_v21 = vsel %vm501_vm1, %v2231_v19, 0.0  ;;  %v690_v22 = vmul.f32 1.442695, %v687_v17  ;;  %v835_v57 = vpack.c.bf16 %v2231_v19, %v2795_v11 }
 0x408   : > { %v682_v24 = vpop.xlane.xlu1 %681  ;;  %833 = vadd.xlane.f32.xlu0 %v832_v21  ;;  %v701_v25 = vpop.permute.xlu0 %700 }
 0x409   : > { %2238 = vpow2.f32 %v1099_v20  ;;  %v686_v26 = vsub.f32 %v2736_v28, %v682_v24  ;;  %2002 = vmatpush3.bf16.msra.mxu1 %v701_v25  ;;  %v561_v20 = vsel %vm501_vm1, %v2679_v60, 0.0 }
 0x40a   : > { %v2233_v27 = vpop.eup %2232  ;;  %2013 = vmatprep.subr.bf16.mxu1 %v2446_v1  ;;  %2240 = vpow2.f32 %v690_v22  ;;  %v564_v22 = vsel %vm501_vm1, %v2681_v61, 0.0 }
 0x40b   : > { %v688_v29 = vmul.f32 1.442695, %v686_v26  ;;  %v965_v30 = vsel %vm501_vm1, %v2233_v27, 0.0 }
 0x40c   : > { %966 = vadd.xlane.f32.xlu1 %v965_v30  ;;  %v1227_v31 = vpop.xlane.xlu1 %1226 }
 0x40d   : > { %2242 = vpow2.f32 %v688_v29  ;;  %v1231_v32 = vsub.f32 %v2750_v40, %v1227_v31 }
 0x40e   : > { %v2235_v33 = vpop.eup %2234 }
 0x40f   : > { %v1233_v34 = vmul.f32 1.442695, %v1231_v32  ;;  %v968_v35 = vsel %vm501_vm1, %v2235_v33, 0.0  ;;  %v971_v3 = vpack.c.bf16 %v2235_v33, %v2233_v27 }
 0x410   : > { %v1230_v36 = vpop.xlane.xlu1 %1229  ;;  %969 = vadd.xlane.f32.xlu0 %v968_v35 }
 0x411   : > { %2244 = vpow2.f32 %v1233_v34  ;;  %v1232_v28 = vsub.f32 %v2754_v43, %v1230_v36 }
 0x412   : > { %v2237_v38 = vpop.eup %2236 }
 0x413   : > { %v1235_v39 = vmul.f32 1.442695, %v1232_v28  ;;  %v1101_v41 = vsel %vm501_vm1, %v2237_v38, 0.0 }
 0x414   : > { %1102 = vadd.xlane.f32.xlu1 %v1101_v41  ;;  %v837_v50 = vpop.permute.xlu1 %836 }
 0x415   : > { %2246 = vpow2.f32 %v1235_v39 }
 0x416   : > { %v2239_v42 = vpop.eup %2238 }
 0x417   : > { %v1104_v44 = vsel %vm501_vm1, %v2239_v42, 0.0  ;;  %v1107_v45 = vpack.c.bf16 %v2239_v42, %v2237_v38  ;;  %v2241_v40 = vpop.eup %2240 }
 0x418   : > { %1105 = vadd.xlane.f32.xlu0 %v1104_v44  ;;  %v695_v56 = vsel %vm501_vm1, %v2241_v40, 0.0 }
 0x41a   : > { %v2243_v47 = vpop.eup %2242 }
 0x41b   : > { %v698_v48 = vpack.c.bf16 %v2241_v40, %v2243_v47  ;;  %v692_v59 = vsel %vm501_vm1, %v2243_v47, 0.0 }
 0x41d   : > { %2004 = vmatmul.mubr.msk.bf16.vlgmr.msra.gmra.mxu1 %vm501_vm1, %v698_v48 }
 0x41e   : > { %v2245_v52 = vpop.eup %2244  ;;  %2014 = vmatpush3.bf16.msra.mxu1 %v837_v50  ;;  %2015 = vmatprep.mubr.msk.bf16.mxu1 %vm2447_vm0, %v2446_v1 }
 0x41f   : > { %v1237_v43 = vsel %vm501_vm1, %v2245_v52, 0.0  ;;  %2025 = vmatprep.subr.bf16.mxu1 %v2446_v1 }
 0x420   : > { %1238 = vadd.xlane.f32.xlu1 %v1237_v43 }
 0x422   : > { %v2247_v54 = vpop.eup %2246 }
 0x423   : > { %v1240_v55 = vsel %vm501_vm1, %v2247_v54, 0.0  ;;  %v1243_v58 = vpack.c.bf16 %v2247_v54, %v2245_v52 }
 0x424   : > { %1241 = vadd.xlane.f32.xlu0 %v1240_v55  ;;  %696 = vadd.xlane.f32.xlu1 %v695_v56 }
 0x425   : > { %2016 = vmatmul.mubr.msk.bf16.vlgmr.msra.gmra.mxu1 %vm501_vm1, %v835_v57 }
 0x426   : > { %2027 = vmatprep.mubr.msk.bf16.mxu1 %vm2447_vm0, %v2446_v1 }
 0x428   : > { %693 = vadd.xlane.f32.xlu0 %v692_v59 }
 0x439   : > { %v1363_v62 = vpop.xlane.xlu0 %1362 }
 0x43a   : > { %v1367_v63 = vsub.f32 %v2758_v46, %v1363_v62 }
 0x43c   : > { %v1369_v0 = vmul.f32 1.442695, %v1367_v63 }
 0x43d   : > { %v973_v2 = vpop.permute.xlu0 %972 }
 0x43e   : > { %2248 = vpow2.f32 %v1369_v0  ;;  %2026 = vmatpush3.bf16.msra.mxu1 %v973_v2 }
 0x43f   : > { %2037 = vmatprep.subr.bf16.mxu1 %v2446_v1 }
 0x441   : > { %2028 = vmatmul.mubr.msk.bf16.vlgmr.msra.gmra.mxu1 %vm501_vm1, %v971_v3 }
 0x442   : > { %2039 = vmatprep.mubr.msk.bf16.mxu1 %vm2447_vm0, %v2446_v1 }
 0x445   : > { %v1366_v4 = vpop.xlane.xlu1 %1365 }
 0x446   : > { %v1368_v5 = vsub.f32 %v2762_v49, %v1366_v4  ;;  %v1245_v49 = vpop.permute.xlu0 %1244 }
 0x448   : > { %v1371_v6 = vmul.f32 1.442695, %v1368_v5 }
 0x449   : > { %v1499_v7 = vpop.xlane.xlu1 %1498 }
 0x44a   : > { %2250 = vpow2.f32 %v1371_v6  ;;  %v1503_v46 = vsub.f32 %v2764_v51, %v1499_v7  ;;  %v1381_v16 = vpop.permute.xlu0 %1380 }
 0x44b   : > { %v2249_v8 = vpop.eup %2248 }
 0x44c   : > { %v1505_v9 = vmul.f32 1.442695, %v1503_v46  ;;  %v1373_v37 = vsel %vm501_vm1, %v2249_v8, 0.0 }
 0x44d   : > { %v1502_v10 = vpop.xlane.xlu1 %1501  ;;  %1374 = vadd.xlane.f32.xlu1 %v1373_v37 }
 0x44e   : > { %2252 = vpow2.f32 %v1505_v9  ;;  %v1504_v11 = vsub.f32 %v2766_v53, %v1502_v10  ;;  %v1517_v24 = vpop.permute.xlu0 %1516 }
 0x450   : > { %v1507_v12 = vmul.f32 1.442695, %v1504_v11 }
 0x451   : > { %v1109_v13 = vpop.permute.xlu1 %1108 }
 0x452   : > { %2254 = vpow2.f32 %v1507_v12  ;;  %2038 = vmatpush3.bf16.msra.mxu1 %v1109_v13 }
 0x453   : > { %2049 = vmatprep.subr.bf16.mxu1 %v2446_v1 }
 0x455   : > { %2040 = vmatmul.mubr.msk.bf16.vlgmr.msra.gmra.mxu1 %vm501_vm1, %v1107_v45 }
 0x456   : > { %2050 = vmatpush3.bf16.msra.mxu1 %v1245_v49  ;;  %2051 = vmatprep.mubr.msk.bf16.mxu1 %vm2447_vm0, %v2446_v1 }
 0x457   : > { %v2251_v51 = vpop.eup %2250  ;;  %2061 = vmatprep.subr.bf16.mxu1 %v2446_v1 }
 0x458   : > { %v1376_v14 = vsel %vm501_vm1, %v2251_v51, 0.0  ;;  %v1379_v21 = vpack.c.bf16 %v2251_v51, %v2249_v8 }
 0x459   : > { %1377 = vadd.xlane.f32.xlu0 %v1376_v14 }
 0x45b   : > { %v2253_v53 = vpop.eup %2252 }
 0x45c   : > { %v1509_v15 = vsel %vm501_vm1, %v2253_v53, 0.0 }
 0x45d   : > { %1510 = vadd.xlane.f32.xlu1 %v1509_v15  ;;  %2052 = vmatmul.mubr.msk.bf16.vlgmr.msra.gmra.mxu1 %vm501_vm1, %v1243_v58 }
 0x45e   : > { %2062 = vmatpush3.bf16.msra.mxu1 %v1381_v16  ;;  %2063 = vmatprep.mubr.msk.bf16.mxu1 %vm2447_vm0, %v2446_v1  ;;  %v2216_v16 = vld [vmem:[#allocation8 + $0x30] sm:$0xff]  }
 0x45f   : > { %v2255_v17 = vpop.eup %2254  ;;  %2073 = vmatprep.subr.bf16.mxu1 %v2446_v1 }
 0x460   : > { %v1512_v19 = vsel %vm501_vm1, %v2255_v17, 0.0  ;;  %v1515_v25 = vpack.c.bf16 %v2255_v17, %v2253_v53 }
 0x461   : > { %1513 = vadd.xlane.f32.xlu0 %v1512_v19  ;;  %562 = vadd.xlane.f32.xlu1 %v561_v20 }
 0x465   : > { %565 = vadd.xlane.f32.xlu0 %v564_v22  ;;  %2064 = vmatmul.mubr.msk.bf16.vlgmr.msra.gmra.mxu1 %vm501_vm1, %v1379_v21 }
 0x466   : > { %2074 = vmatpush3.bf16.msra.mxu1 %v1517_v24  ;;  %2075 = vmatprep.mubr.msk.bf16.mxu1 %vm2447_vm0, %v2446_v1  ;;  %v2217_v24 = vld [vmem:[#allocation8 + $0x28] sm:$0xff]  }
 0x46d   : > { %2076 = vmatmul.mubr.msk.bf16.vlgmr.msra.gmra.mxu1 %vm501_vm1, %v1515_v25 }
 0x48d   : > { %v831_v26 = vpop.xlane.xlu0 %830 }
 0x491   : > { %v834_v27 = vpop.xlane.xlu0 %833 }
 0x495   : > { %v967_v29 = vpop.xlane.xlu1 %966 }
 0x499   : > { %v970_v60 = vpop.xlane.xlu0 %969 }
 0x49d   : > { %v1103_v31 = vpop.xlane.xlu1 %1102 }
 0x4a1   : > { %v2851_v30 = vpop.xlane.xlu0 %1105 }
 0x4a9   : > { %v2855_v61 = vpop.xlane.xlu1 %1238 }
 0x4ad   : > { %v2853_v32 = vpop.xlane.xlu0 %1241  ;;  %v697_v34 = vpop.xlane.xlu1 %696 }
 0x4b1   : > { %v694_v33 = vpop.xlane.xlu0 %693 }
 0x4b2   : > { %2256 = vrcp.f32 %v694_v33 }
 0x4b3   : > { %2258 = vrcp.f32 %v697_v34 }
 0x4b4   : > { %2260 = vrcp.f32 %v831_v26 }
 0x4b5   : > { %2262 = vrcp.f32 %v834_v27 }
 0x4bf   : > { %v2257_v35 = vpop.eup %2256 }
 0x4c0   : > { %v2259_v41 = vpop.eup %2258 }
 0x4c1   : > { %v2261_v48 = vpop.eup %2260 }
 0x4c2   : > { %v2263_v57 = vpop.eup %2262 }
 0x4d6   : > { %v1375_v44 = vpop.xlane.xlu1 %1374 }
 0x4dd   : > { %v740_v36 = vpop.f32.mrf.mxu1 }
 0x4de   : > { %v749_v28 = vmul.f32 %v2257_v35, %v740_v36  ;;  %v2219_v35 = vld [vmem:[#allocation8 + $0x18] sm:$0xff]  }
 0x4df   : > { %v2005_v38 = vpop.f32.mrf.mxu1 }
 0x4e0   : > { %v1898_v39 = vpack.c.bf16 %v749_v28, %v749_v28 }
 0x4e1   : > { %v743_v42 = vpop.f32.mrf.mxu1 }
 0x4e2   : > { %v750_v45 = vmul.f32 %v2259_v41, %v743_v42  ;;  %757 = vrot.lane.b32.xlu1 %v1898_v39, %s2454_s8  ;;  %v2858_v52 = vpop.xlane.xlu0 %1377  ;;  %v2220_v42 = vld [vmem:[#allocation8 + $0x10] sm:$0xff]  }
 0x4e3   : > { %v2006_v40 = vpop.f32.mrf.mxu1 }
 0x4e4   : > { %v1899_v47 = vpack.c.bf16 %v750_v45, %v750_v45 }
 0x4e5   : > { %v876_v50 = vpop.f32.mrf.mxu1 }
 0x4e6   : > { %v885_v43 = vmul.f32 %v2261_v48, %v876_v50  ;;  %v2860_v54 = vpop.xlane.xlu1 %1510  ;;  %759 = vrot.lane.b32.xlu0 %v1899_v47, %s2454_s8  ;;  %v2221_v50 = vld [vmem:[#allocation8 + $0x8] sm:$0xff]  }
 0x4e7   : > { %v2017_v55 = vpop.f32.mrf.mxu1 }
 0x4e8   : > { %v1900_v56 = vpack.c.bf16 %v885_v43, %v885_v43 }
 0x4e9   : > { %v879_v58 = vpop.f32.mrf.mxu1 }
 0x4ea   : > { %v886_v59 = vmul.f32 %v2263_v57, %v879_v58  ;;  %v563_v62 = vpop.xlane.xlu1 %562  ;;  %v2863_v63 = vpop.xlane.xlu0 %1513  ;;  %893 = vrot.lane.b32.xlu1 %v1900_v56, %s2453_s7 }
 0x4eb   : > { %2264 = vrcp.f32 %v563_v62  ;;  %v2018_v0 = vpop.f32.mrf.mxu1 }
 0x4ec   : > { %v1901_v2 = vpack.c.bf16 %v886_v59, %v886_v59 }
 0x4ee   : > { %v566_v3 = vpop.xlane.xlu0 %565  ;;  %895 = vrot.lane.b32.xlu1 %v1901_v2, %s2453_s7 }
 0x4ef   : > { %2266 = vrcp.f32 %v566_v3 }
 0x4f0   : > { %2268 = vrcp.f32 %v967_v29 }
 0x4f1   : > { %2270 = vrcp.f32 %v970_v60 }
 0x4f2   : > { %2272 = vrcp.f32 %v1103_v31 }
 0x4f3   : > { %2274 = vrcp.f32 %v2851_v30  ;;  %v2218_v30 = vld [vmem:[#allocation8 + $0x20] sm:$0xff]  }
 0x4f4   : > { %2276 = vrcp.f32 %v2855_v61 }
 0x4f5   : > { %2278 = vrcp.f32 %v2853_v32 }
 0x4f6   : > { %2280 = vrcp.f32 %v1375_v44 }
 0x4f7   : > { %2282 = vrcp.f32 %v2858_v52 }
 0x4f8   : > { %v2265_v4 = vpop.eup %2264  ;;  %2284 = vrcp.f32 %v2860_v54  ;;  %v2222_v54 = vld [vmem:[#allocation8] sm:$0xff]  }
 0x4f9   : > { %v614_v5 = vmul.f32 %v2265_v4, %v2724_v18  ;;  %2286 = vrcp.f32 %v2863_v63 }
 0x4fb   : > { %v1896_v6 = vpack.c.bf16 %v614_v5, %v614_v5 }
 0x4fc   : > { %v2267_v7 = vpop.eup %2266 }
 0x4fd   : > { %625 = vst.msk [vmem:[#allocation2] sm:$0xf] %vm624_vm2, %v1896_v6  ;;  %v615_v46 = vmul.f32 %v2267_v7, %v2730_v23  ;;  %v2269_v9 = vpop.eup %2268  ;;  %v2215_v23 = vld [vmem:[#allocation8 + $0x38] sm:$0xff]  }
 0x4fe   : > { %v2271_v13 = vpop.eup %2270  ;;  %2080 = vmatpush3.bf16.msra.mxu0 %v2215_v23 }
 0x4ff   : > { %v1897_v8 = vpack.c.bf16 %v615_v46, %v615_v46  ;;  %2081 = vmatprep.subr.bf16.mxu0 %v2446_v1  ;;  %v2273_v53 = vpop.eup %2272 }
 0x500   : > { %v2275_v21 = vpop.eup %2274 }
 0x501   : > { %v1012_v37 = vpop.f32.mrf.mxu1  ;;  %626 = vst.msk [vmem:[#allocation2 + $0x4] sm:$0xf] %vm624_vm2, %v1897_v8  ;;  %v2277_v60 = vpop.eup %2276 }
 0x502   : > { %v1021_v10 = vmul.f32 %v2269_v9, %v1012_v37  ;;  %2082 = vmatpush3.bf16.msra.mxu0 %v2216_v16  ;;  %v2279_v33 = vpop.eup %2278 }
 0x503   : > { %v2029_v11 = vpop.f32.mrf.mxu1  ;;  %2083 = vmatprep.subr.bf16.mxu0 %v2446_v1  ;;  %v2281_v39 = vpop.eup %2280 }
 0x504   : > { %v1902_v12 = vpack.c.bf16 %v1021_v10, %v1021_v10  ;;  %v2283_v47 = vpop.eup %2282 }
 0x505   : > { %v1015_v49 = vpop.f32.mrf.mxu1  ;;  %v2285_v56 = vpop.eup %2284 }
 0x506   : > { %v1022_v51 = vmul.f32 %v2271_v13, %v1015_v49  ;;  %1029 = vrot.lane.b32.xlu0 %v1902_v12, %s2452_s5  ;;  %2084 = vmatpush3.bf16.msra.mxu0 %v2217_v24  ;;  %v2287_v63 = vpop.eup %2286 }
 0x507   : > { %v2030_v14 = vpop.f32.mrf.mxu1  ;;  %2085 = vmatprep.subr.bf16.mxu0 %v2446_v1 }
 0x508   : > { %v1903_v18 = vpack.c.bf16 %v1022_v51, %v1022_v51 }
 0x50a   : > { %1031 = vrot.lane.b32.xlu1 %v1903_v18, %s2452_s5  ;;  %2086 = vmatpush3.bf16.msra.mxu0 %v2218_v30  ;;  %v1880_v18 = vld [vmem:[%s2948_s3] ss:$0 sm:$0xff] }
 0x50b   : > { %2087 = vmatprep.subr.bf16.mxu0 %v2446_v1 }
 0x50e   : > { %2088 = vmatpush3.bf16.msra.mxu0 %v2219_v35 }
 0x50f   : > { %2089 = vmatprep.subr.bf16.mxu0 %v2446_v1 }
 0x512   : > { %2090 = vmatpush3.bf16.msra.mxu0 %v2220_v42 }
 0x513   : > { %2091 = vmatprep.subr.bf16.mxu0 %v2446_v1 }
 0x515   : > { %v1148_v15 = vpop.f32.mrf.mxu1 }
 0x516   : > { %v1157_v17 = vmul.f32 %v2273_v53, %v1148_v15  ;;  %2092 = vmatpush3.bf16.msra.mxu0 %v2221_v50 }
 0x517   : > { %v2041_v19 = vpop.f32.mrf.mxu1  ;;  %2093 = vmatprep.subr.bf16.mxu0 %v2446_v1 }
 0x518   : > { %v1904_v20 = vpack.c.bf16 %v1157_v17, %v1157_v17 }
 0x519   : > { %v1151_v22 = vpop.f32.mrf.mxu1 }
 0x51a   : > { %v1158_v25 = vmul.f32 %v2275_v21, %v1151_v22  ;;  %1165 = vrot.lane.b32.xlu0 %v1904_v20, %s2451_s10  ;;  %2094 = vmatpush3.bf16.msra.mxu0 %v2222_v54 }
 0x51b   : > { %v2042_v26 = vpop.f32.mrf.mxu1 }
 0x51c   : > { %v1905_v27 = vpack.c.bf16 %v1158_v25, %v1158_v25 }
 0x51d   : > { %v1284_v29 = vpop.f32.mrf.mxu1 }
 0x51e   : > { %v1293_v31 = vmul.f32 %v2277_v60, %v1284_v29  ;;  %1167 = vrot.lane.b32.xlu1 %v1905_v27, %s2451_s10 }
 0x51f   : > { %v2053_v32 = vpop.f32.mrf.mxu1 }
 0x520   : > { %v1906_v61 = vpack.c.bf16 %v1293_v31, %v1293_v31 }
 0x521   : > { %v1287_v34 = vpop.f32.mrf.mxu1 }
 0x522   : > { %v1294_v36 = vmul.f32 %v2279_v33, %v1287_v34  ;;  %1301 = vrot.lane.b32.xlu0 %v1906_v61, %s2450_s9 }
 0x523   : > { %v2054_v28 = vpop.f32.mrf.mxu1 }
 0x524   : > { %v1907_v38 = vpack.c.bf16 %v1294_v36, %v1294_v36 }
 0x525   : > { %v1420_v41 = vpop.f32.mrf.mxu1 }
 0x526   : > { %v1429_v44 = vmul.f32 %v2281_v39, %v1420_v41  ;;  %1303 = vrot.lane.b32.xlu1 %v1907_v38, %s2450_s9  ;;  %s2372_s9 = sshll.u32 %s2455_s19, 4  ;;  %s2373_s9 = int_to_ptr.vmem [resolvable:$false] %s2372_s9 }
 0x527   : > { %v2065_v45 = vpop.f32.mrf.mxu1  ;;  %s2374_s10 = scalar_lea.vmem %s2373_s9, 512  ;;  %p2375_p6 = scmp.lt.s32.totalorder %s2897_s6, %s2373_s9 }
 0x528   : > { %v1908_v40 = vpack.c.bf16 %v1429_v44, %v1429_v44 }
 0x529   : > { %v1423_v48 = vpop.f32.mrf.mxu1 }
 0x52a   : > { %v1430_v52 = vmul.f32 %v2283_v47, %v1423_v48  ;;  %1437 = vrot.lane.b32.xlu0 %v1908_v40, %s2449_s23 }
 0x52b   : > { %v2066_v43 = vpop.f32.mrf.mxu1 }
 0x52c   : > { %v1909_v55 = vpack.c.bf16 %v1430_v52, %v1430_v52 }
 0x52d   : > { %v1556_v57 = vpop.f32.mrf.mxu1 }
 0x52e   : > { %v1565_v58 = vmul.f32 %v2285_v56, %v1556_v57  ;;  %1439 = vrot.lane.b32.xlu1 %v1909_v55, %s2449_s23  ;;  %s2368_s23 = scalar_lea.vmem %s2897_s6, 256 }
 0x52f   : > { %v2077_v59 = vpop.f32.mrf.mxu1  ;;  %p2369_p11 = scmp.ne.s32.totalorder %s2897_s6, %s2368_s23  ;;  %p2376_p12 = scmp.lt.s32.totalorder %s2374_s10, %s2368_s23 }
 0x530   : > { %v1910_v62 = vpack.c.bf16 %v1565_v58, %v1565_v58 }
 0x531   : > { %v1559_v0 = vpop.f32.mrf.mxu1  ;;  %p2370_p1 = pnand %p2369_p11, %p2965_p10  ;;  %p2377_p3 = por %p2376_p12, %p2375_p6 }
 0x532   : > { %v1566_v2 = vmul.f32 %v2287_v63, %v1559_v0  ;;  %1573 = vrot.lane.b32.xlu0 %v1910_v62, %s2448_s21 }
 0x533   : > { %v2078_v3 = vpop.f32.mrf.mxu1  ;;  %p2371_p2 = pneg %p2370_p1 }
 0x534   : > { %v1911_v4 = vpack.c.bf16 %v1566_v2, %v1566_v2 }
 0x535   : > { %p2378_p9 = pnand %p2377_p3, %p2371_p2 }
 0x536   : > { %1575 = vrot.lane.b32.xlu1 %v1911_v4, %s2448_s21  ;;  %s1705_s21 = scalar_lea.sflag [#allocation5], %s2616_s12 }
 0x554   : > { %v758_v5 = vpop.permute.xlu1 %757 }
 0x555   : > { %764 = vst.msk [vmem:[#allocation2] sm:$0xf] %vm763_vm3, %v758_v5 }
 0x558   : > { %v760_v1 = vpop.permute.xlu0 %759 }
 0x559   : > { %765 = vst.msk [vmem:[#allocation2 + $0x4] sm:$0xf] %vm763_vm3, %v760_v1 }
 0x55c   : > { %v894_v6 = vpop.permute.xlu1 %893 }
 0x55d   : > { %900 = vst.msk [vmem:[#allocation2] sm:$0xf] %vm899_vm4, %v894_v6 }
 0x560   : > { %v896_v7 = vpop.permute.xlu1 %895 }
 0x561   : > { %901 = vst.msk [vmem:[#allocation2 + $0x4] sm:$0xf] %vm899_vm4, %v896_v7 }
 0x578   : > { %v1030_v46 = vpop.permute.xlu0 %1029 }
 0x579   : > { %1036 = vst.msk [vmem:[#allocation2] sm:$0xf] %vm1035_vm5, %v1030_v46 }
 0x57c   : > { %v1032_v8 = vpop.permute.xlu1 %1031 }
 0x57d   : > { %1037 = vst.msk [vmem:[#allocation2 + $0x4] sm:$0xf] %vm1035_vm5, %v1032_v8 }
 0x58c   : > { %v1166_v9 = vpop.permute.xlu0 %1165 }
 0x58d   : > { %1172 = vst.msk [vmem:[#allocation2] sm:$0xf] %vm1171_vm6, %v1166_v9 }
 0x590   : > { %v1168_v37 = vpop.permute.xlu1 %1167 }
 0x591   : > { %1173 = vst.msk [vmem:[#allocation2 + $0x4] sm:$0xf] %vm1171_vm6, %v1168_v37 }
 0x594   : > { %v1302_v10 = vpop.permute.xlu0 %1301 }
 0x595   : > { %1308 = vst.msk [vmem:[#allocation2] sm:$0xf] %vm1307_vm7, %v1302_v10 }
 0x598   : > { %v1304_v11 = vpop.permute.xlu1 %1303 }
 0x599   : > { %1309 = vst.msk [vmem:[#allocation2 + $0x4] sm:$0xf] %vm1307_vm7, %v1304_v11 }
 0x59c   : > { %v1438_v12 = vpop.permute.xlu0 %1437 }
 0x59d   : > { %1444 = vst.msk [vmem:[#allocation2] sm:$0xf] %vm1443_vm8, %v1438_v12 }
 0x5a0   : > { %v1440_v13 = vpop.permute.xlu1 %1439 }
 0x5a1   : > { %1445 = vst.msk [vmem:[#allocation2 + $0x4] sm:$0xf] %vm1443_vm8, %v1440_v13 }
 0x5a4   : > { %v1574_v49 = vpop.permute.xlu0 %1573 }
 0x5a5   : > { %1580 = vst.msk [vmem:[#allocation2] sm:$0xf] %vm1579_vm9, %v1574_v49 }
 0x5a8   : > { %v1576_v51 = vpop.permute.xlu1 %1575 }
 0x5a9   : > { %1581 = vst.msk [vmem:[#allocation2 + $0x4] sm:$0xf] %vm1579_vm9, %v1576_v51 }
 0x5b0   : > { %v2223_v14 = vld [vmem:[#allocation2] sm:$0xff]  }
 0x5b1   : > { %2096 = vmatmul.mubr.bf16.vlgmr.msra.gmra.mxu0 %v2223_v14 }
 0x671   : > { %v1695_v23 = vpop.f32.mrf.mxu0 }
 0x672   : > { %v1696_v53 = vadd.f32 %v1880_v18, %v1695_v23 }
 0x673   : > { %v2097_v15 = vpop.f32.mrf.mxu0 }
 0x674   : > { %1702 = vst [vmem:[%s244_s30] sm:$0xff] %v1696_v53 }
 0x675   : > { %v1698_v16 = vpop.f32.mrf.mxu0 }
 0x676   : > { %v1699_v17 = vadd.f32 %v1880_v18, %v1698_v16 }
 0x677   : > { %v2098_v19 = vpop.f32.mrf.mxu0 }
 0x678   : > { %1703 = vst [vmem:[%s244_s30 + $0x8] sm:$0xff] %v1699_v17 }
 0x679   : > { %2381 = shalt.err (!%p2378_p9)
}
 0x67a   : > { %s2382_s5 = scalar_lea.hbm %s2902_s28, 256  ;;  %s2386_s11 = scalar_lea.hbm %s2949_s4, 512 }
 0x67b   : > { %p2383_p13 = scmp.ne.s32.totalorder %s2902_s28, %s2382_s5  ;;  %p2387_p4 = scmp.lt.s32.totalorder %s2902_s28, %s2949_s4 }
 0x67c   : > { %p2388_p8 = scmp.lt.s32.totalorder %s2386_s11, %s2382_s5 }
 0x67d   : > { %p2384_p5 = pnand %p2383_p13, %p2965_p10 }
 0x67e   : > { %p2389_p7 = por %p2388_p8, %p2387_p4 }
 0x67f   : > { %p2385_p0 = pneg %p2384_p5 }
 0x681   : > { %p2390_p11 = pnand %p2389_p7, %p2385_p0 }
 0x683   : > { %2393 = shalt.err (!%p2390_p11)
}
 0x684   : > { %s2456_s30 = smov 128   ;;  %s2457_s14 = smov 8  }
 0x685   : > { %2109 = dma.vmem_to_hbm [thread:$0]  (%p2965_p10), %s2897_s6, 256, %s2902_s28, %s1705_s21, %s2456_s30, %s2456_s30, %s2457_s14  }
 0x686 PF: > { %s1733_s20 = sand.u32 1, %s2424_s15   ;;  %p2966_p1 = scmp.ne.s32.totalorder %s2955_s22, 0 }
 0x687   : > { %p2967_p2 = scmp.ge.s32.totalorder %s2436_s18, 2  ;;  %s1734_s27 = scalar_lea.sflag [#allocation5], %s1733_s20 }
 0x689   : > { %p2123_p6 = pnand %p2967_p2, %p2966_p1 }
 0x68b   : > { %p2124_p12 = pneg %p2123_p6 }
 0x68d   : > { %2419 = dma.done.wait (%p2124_p12), %s1734_s27, 256  }
 0x68e   : > { %2421 = vsyncadd (%p2124_p12), %s1734_s27, 4294967040  ;;  %p18_p3 = scmp.ge.s32.totalorder %s2558_s13, 4   ;;  %s2968_s15 = smov %s2428_s16 }
 0x68f   : > { %s2969_s16 = smov %s2432_s17  ;;  %s2970_s17 = smov %s2567_s24 }
 0x690   : > { %s2971_s18 = smov %s2558_s13  ;;  %20 = sbr.rel (!%p18_p3) target bundleno = 6 (0x6), region = 89 }
 0x695   :  { %1739 = vsyncpa [#allocation4], 1 }
 0x696   :  { %1741 = vsyncpa [#allocation4 + $0x1], 1 }
 0x697   :  { %1742 = vsyncpa [#allocation7], 1 }
 0x698   :  { %1743 = vsyncpa [#allocation5], 1 }
 0x699   :  { %1745 = vsyncpa [#allocation5 + $0x1], 1 }

</bundles_post_ra>
